<compile_context>
chip_gen: v5e
topology: v5e:2x2
jax: 0.10.0
libtpu: 0.0.40
codegen_flags: <defaults>
</compile_context>

<pallas_src>
import functools

import jax
import jax.numpy as jnp
from jax import lax
from jax.experimental import pallas as pl
from jax.experimental.pallas import tpu as pltpu

BN_EPS = 1e-5     # nn.BatchNorm1d default eps
EPSILON = 1e-6    # module's epsilon in normalize_edges


# ---------------------------------------------------------------------------
# Small helpers
# ---------------------------------------------------------------------------
def _round_up(v, m):
    return ((v + m - 1) // m) * m


def _pad_to(a, rows, cols, fill=0.0):
    return jnp.pad(a, ((0, rows - a.shape[0]), (0, cols - a.shape[1])),
                   constant_values=fill)


def _vmem_limit_bytes():
    """75% of physical VMEM, capped at 96 MiB (v5e/v6e: 128 MiB, v7x: 64 MiB)."""
    cap = None
    try:
        cap = getattr(pltpu.get_tpu_info(), "vmem_capacity_bytes", None)
    except Exception:
        cap = None
    if not cap:
        return 48 * 1024 * 1024
    return int(min(0.75 * cap, 96 * 1024 * 1024))


def _chunk_onehot(idx_col, chunk_start, tile_e, nc):
    """Exact 0/1 bf16 one-hot block [TE, NC] for node ids in
    [chunk_start, chunk_start + nc).  Padded edges carry an out-of-range
    sentinel id, so their rows are all-zero without any extra mask."""
    iota = chunk_start + lax.broadcasted_iota(jnp.int32, (tile_e, nc), 1)
    return jnp.where(idx_col == iota, 1.0, 0.0).astype(jnp.bfloat16)


# ---------------------------------------------------------------------------
# Pass 1: zw = W_gate(cat(x[src], x[dst], e)) per edge tile (bf16 stream)
#         + one-pass BatchNorm statistics (sum / sumsq in f32)
# ---------------------------------------------------------------------------
def _pass1_kernel(x_ref, e_ref, src_ref, dst_ref, wg_sd_ref, wge_ref, bg_ref,
                  zw_ref, zsum_ref, zsq_ref, xsd_scr,
                  *, n_edges, tile_e, n_chunks, nc):
    t = pl.program_id(0)
    f32 = jnp.float32
    h_pad = zw_ref.shape[1]

    @pl.when(t == 0)
    def _init():
        # Fused 2*H-wide projection: x @ [Wg_src | Wg_dst] in a single MXU pass.
        xsd_scr[...] = jnp.dot(x_ref[...], wg_sd_ref[...],
                               preferred_element_type=f32).astype(jnp.bfloat16)
        zsum_ref[...] = jnp.zeros_like(zsum_ref)
        zsq_ref[...] = jnp.zeros_like(zsq_ref)

    src_col = src_ref[...]
    dst_col = dst_ref[...]

    zw = jnp.dot(e_ref[...], wge_ref[...], preferred_element_type=f32) + bg_ref[...]
    for c in range(n_chunks):                       # node-axis chunking (static)
        lo = c * nc
        oh_s = _chunk_onehot(src_col, lo, tile_e, nc)
        oh_d = _chunk_onehot(dst_col, lo, tile_e, nc)
        zw += jnp.dot(oh_s, xsd_scr[lo:lo + nc, 0:h_pad],
                      preferred_element_type=f32)
        zw += jnp.dot(oh_d, xsd_scr[lo:lo + nc, h_pad:2 * h_pad],
                      preferred_element_type=f32)

    zw_ref[...] = zw.astype(zw_ref.dtype)           # bf16 HBM stream

    # BN batch statistics from the f32 value; padded edge rows masked with a
    # cheap [TE,1] row iota (padded rows equal bg, so they must be excluded).
    row_valid = (t * tile_e
                 + lax.broadcasted_iota(jnp.int32, (tile_e, 1), 0)) < n_edges
    zm = jnp.where(row_valid, zw, 0.0)
    zsum_ref[...] += jnp.sum(zm, axis=0, keepdims=True)
    zsq_ref[...] += jnp.sum(zm * zw, axis=0, keepdims=True)


# ---------------------------------------------------------------------------
# Pass 2+3 fused (2-phase leading grid axis):
#   phase 0: e_hat = SiLU(BN(zw));  ssum += segment_sum(sigmoid(e_hat), src)
#   phase 1: normalize edges, aggregate to nodes, node BN/SiLU/residual
# ---------------------------------------------------------------------------
def _pass23_kernel(zw_ref, az_ref, bz_ref, src_ref, dst_ref, x_ref,
                   ws_ref, bs_ref, wd_ref, bd_ref, gn_ref, bnb_ref,
                   ehat_ref, node_ref,
                   ssum_scr, ssumb_scr, dstup_scr, agg_scr,
                   *, n_nodes, tile_e, n_chunks, nc):
    phase = pl.program_id(0)
    t = pl.program_id(1)
    f32 = jnp.float32
    h_pad = zw_ref.shape[1]

    src_col = src_ref[...]
    dst_col = dst_ref[...]

    # BN (precomputed scale/shift) + SiLU; Dropout(p=0) == identity.
    zn = zw_ref[...].astype(f32) * az_ref[...] + bz_ref[...]
    e_hat = zn * jax.nn.sigmoid(zn)
    # Stored in both phases (phase 1 recomputes identical values) so the
    # streamed output buffer is always fully written.
    ehat_ref[...] = e_hat
    sigma = jax.nn.sigmoid(e_hat)
    sigma_b = sigma.astype(jnp.bfloat16)

    @pl.when((phase == 0) & (t == 0))
    def _init0():
        ssum_scr[...] = jnp.zeros_like(ssum_scr)
        dstup_scr[...] = (jnp.dot(x_ref[...], wd_ref[...],
                                  preferred_element_type=f32)
                          + bd_ref[...]).astype(jnp.bfloat16)

    @pl.when(phase == 0)
    def _phase0():
        # segment-sum over src == S^T @ sigma, per node-chunk (f32 accumulator).
        for c in range(n_chunks):
            lo = c * nc
            oh_s = _chunk_onehot(src_col, lo, tile_e, nc)
            ssum_scr[lo:lo + nc, :] += lax.dot_general(
                oh_s, sigma_b,
                dimension_numbers=(((0,), (0,)), ((), ())),
                preferred_element_type=f32)

    @pl.when((phase == 1) & (t == 0))
    def _init1():
        ssumb_scr[...] = ssum_scr[...].astype(jnp.bfloat16)
        agg_scr[...] = jnp.zeros_like(agg_scr)

    @pl.when(phase == 1)
    def _phase1():
        denom = jnp.zeros((tile_e, h_pad), f32)
        thee = jnp.zeros((tile_e, h_pad), f32)
        for c in range(n_chunks):                   # gathers (chunked)
            lo = c * nc
            oh_s = _chunk_onehot(src_col, lo, tile_e, nc)
            oh_d = _chunk_onehot(dst_col, lo, tile_e, nc)
            denom += jnp.dot(oh_s, ssumb_scr[lo:lo + nc, :],
                             preferred_element_type=f32)
            thee += jnp.dot(oh_d, dstup_scr[lo:lo + nc, :],
                            preferred_element_type=f32)
        norm_e = sigma * pl.reciprocal(denom + EPSILON, approx=True)
        contrib = (norm_e * thee).astype(jnp.bfloat16)
        for c in range(n_chunks):                   # scatter (chunked)
            lo = c * nc
            oh_s = _chunk_onehot(src_col, lo, tile_e, nc)
            agg_scr[lo:lo + nc, :] += lax.dot_general(
                oh_s, contrib,
                dimension_numbers=(((0,), (0,)), ((), ())),
                preferred_element_type=f32)

    @pl.when((phase == 1) & (t == pl.num_programs(1) - 1))
    def _finalize():
        x = x_ref[...]
        src_up = jnp.dot(x, ws_ref[...], preferred_element_type=f32) + bs_ref[...]
        h = src_up + agg_scr[...]
        n_pad = x.shape[0]
        if n_pad == n_nodes:
            mu = jnp.mean(h, axis=0, keepdims=True)
            var = jnp.mean(h * h, axis=0, keepdims=True) - mu * mu
        else:
            # node BatchNorm statistics over the real N rows only.
            rmask = (lax.broadcasted_iota(jnp.int32, (n_pad, 1), 0)
                     < n_nodes).astype(jnp.float32)
            hm = h * rmask
            mu = jnp.sum(hm, axis=0, keepdims=True) / float(n_nodes)
            var = jnp.sum(hm * h, axis=0, keepdims=True) / float(n_nodes) - mu * mu
        hn = (h - mu) * lax.rsqrt(var + BN_EPS) * gn_ref[...] + bnb_ref[...]
        node_ref[...] = x + hn * jax.nn.sigmoid(hn)


# ---------------------------------------------------------------------------
# Wrapper: padding, grid setup, 2 pallas_calls + tiny [1,H] JAX glue
# ---------------------------------------------------------------------------
@functools.partial(jax.jit, static_argnames=("tile_e", "node_chunk"))
def edge_gated_graph_conv(edge_index, node_features, edge_features, params,
                          *, tile_e=512, node_chunk=256):
    N, H = node_features.shape
    E = edge_features.shape[0]
    f32 = jnp.float32

    H_pad = pl.cdiv(H, 128) * 128                 # lane-dense hidden dim
    TE = int(tile_e)
    assert TE % 16 == 0, "edge tile must be a multiple of 16 (bf16 sublanes)"
    E_pad = pl.cdiv(E, TE) * TE
    n_tiles = E_pad // TE

    # Node-axis chunking bounds the one-hot footprint independently of N.
    if N <= node_chunk:
        NC = _round_up(max(N, 8), 8)
        N_pad = NC
    else:
        assert node_chunk % 8 == 0
        NC = int(node_chunk)
        N_pad = _round_up(N, NC)
    n_chunks = N_pad // NC
    sentinel = N_pad                              # out-of-range node id for padded edges

    # ---- pad to lane/sublane-dense shapes (BN gammas padded with 1) ---------
    x_p = _pad_to(node_features.astype(f32), N_pad, H_pad)
    e_p = _pad_to(edge_features.astype(f32), E_pad, H_pad)
    src_p = jnp.pad(edge_index[0].astype(jnp.int32), (0, E_pad - E),
                    constant_values=sentinel).reshape(E_pad, 1)
    dst_p = jnp.pad(edge_index[1].astype(jnp.int32), (0, E_pad - E),
                    constant_values=sentinel).reshape(E_pad, 1)

    wg_sd = jnp.concatenate(
        [_pad_to(params["wg_s"].astype(f32), H_pad, H_pad),
         _pad_to(params["wg_d"].astype(f32), H_pad, H_pad)], axis=1)  # [H, 2H]
    wge = _pad_to(params["wg_e"].astype(f32), H_pad, H_pad)
    bg = _pad_to(params["bg"].astype(f32), 1, H_pad)
    ws = _pad_to(params["ws"].astype(f32), H_pad, H_pad)
    bs = _pad_to(params["bs"].astype(f32), 1, H_pad)
    wd = _pad_to(params["wd"].astype(f32), H_pad, H_pad)
    bd = _pad_to(params["bd"].astype(f32), 1, H_pad)
    gz = _pad_to(params["gz"].astype(f32), 1, H_pad, fill=1.0)
    bz = _pad_to(params["bz"].astype(f32), 1, H_pad)
    gn = _pad_to(params["gn"].astype(f32), 1, H_pad, fill=1.0)
    bnb = _pad_to(params["bn"].astype(f32), 1, H_pad)

    vmem_limit = _vmem_limit_bytes()

    # ---- pass 1: zw (bf16 stream) + one-pass BN statistics -------------------
    zw, zsum, zsq = pl.pallas_call(
        functools.partial(_pass1_kernel, n_edges=E, tile_e=TE,
                          n_chunks=n_chunks, nc=NC),
        grid=(n_tiles,),
        in_specs=[
            pl.BlockSpec((N_pad, H_pad), lambda t: (0, 0)),        # x (resident)
            pl.BlockSpec((TE, H_pad), lambda t: (t, 0)),           # e (stream)
            pl.BlockSpec((TE, 1), lambda t: (t, 0)),               # src ids
            pl.BlockSpec((TE, 1), lambda t: (t, 0)),               # dst ids
            pl.BlockSpec((H_pad, 2 * H_pad), lambda t: (0, 0)),    # [Wg_src|Wg_dst]
            pl.BlockSpec((H_pad, H_pad), lambda t: (0, 0)),        # Wg_e
            pl.BlockSpec((1, H_pad), lambda t: (0, 0)),            # b_gate
        ],
        out_specs=(
            pl.BlockSpec((TE, H_pad), lambda t: (t, 0)),           # zw (bf16)
            pl.BlockSpec((1, H_pad), lambda t: (0, 0)),            # sum(z)
            pl.BlockSpec((1, H_pad), lambda t: (0, 0)),            # sum(z^2)
        ),
        out_shape=(jax.ShapeDtypeStruct((E_pad, H_pad), jnp.bfloat16),
                   jax.ShapeDtypeStruct((1, H_pad), f32),
                   jax.ShapeDtypeStruct((1, H_pad), f32)),
        scratch_shapes=[pltpu.VMEM((N_pad, 2 * H_pad), jnp.bfloat16)],
        compiler_params=pltpu.CompilerParams(
            dimension_semantics=("arbitrary",),
            vmem_limit_bytes=vmem_limit),
        cost_estimate=pl.CostEstimate(
            flops=4 * N_pad * H_pad * H_pad + 2 * E_pad * H_pad * H_pad
                  + 4 * E_pad * N_pad * H_pad,
            transcendentals=0,
            bytes_accessed=4 * (N_pad * H_pad + E_pad * H_pad + 3 * H_pad * H_pad)
                           + 2 * E_pad * H_pad + 8 * E_pad),
    )(x_p, e_p, src_p, dst_p, wg_sd, wge, bg)

    # ---- tiny [1,H] glue: fold BN batch stats into a scale/shift -------------
    mean_z = zsum / float(E)
    var_z = zsq / float(E) - mean_z * mean_z      # biased variance (training BN)
    a_z = gz * lax.rsqrt(var_z + BN_EPS)
    b_z = bz - mean_z * a_z

    # ---- fused pass 2+3 -------------------------------------------------------
    e_hat, node_out = pl.pallas_call(
        functools.partial(_pass23_kernel, n_nodes=N, tile_e=TE,
                          n_chunks=n_chunks, nc=NC),
        grid=(2, n_tiles),                          # (phase, edge tile)
        in_specs=[
            pl.BlockSpec((TE, H_pad), lambda p, t: (t, 0)),        # zw (bf16 stream)
            pl.BlockSpec((1, H_pad), lambda p, t: (0, 0)),         # BN scale
            pl.BlockSpec((1, H_pad), lambda p, t: (0, 0)),         # BN shift
            pl.BlockSpec((TE, 1), lambda p, t: (t, 0)),            # src ids
            pl.BlockSpec((TE, 1), lambda p, t: (t, 0)),            # dst ids
            pl.BlockSpec((N_pad, H_pad), lambda p, t: (0, 0)),     # x (resident)
            pl.BlockSpec((H_pad, H_pad), lambda p, t: (0, 0)),     # W_src
            pl.BlockSpec((1, H_pad), lambda p, t: (0, 0)),         # b_src
            pl.BlockSpec((H_pad, H_pad), lambda p, t: (0, 0)),     # W_dst
            pl.BlockSpec((1, H_pad), lambda p, t: (0, 0)),         # b_dst
            pl.BlockSpec((1, H_pad), lambda p, t: (0, 0)),         # node BN gamma
            pl.BlockSpec((1, H_pad), lambda p, t: (0, 0)),         # node BN beta
        ],
        out_specs=(
            pl.BlockSpec((TE, H_pad), lambda p, t: (t, 0)),        # e_hat (f32)
            pl.BlockSpec((N_pad, H_pad), lambda p, t: (0, 0)),     # node_out (resident)
        ),
        out_shape=(jax.ShapeDtypeStruct((E_pad, H_pad), f32),
                   jax.ShapeDtypeStruct((N_pad, H_pad), f32)),
        scratch_shapes=[pltpu.VMEM((N_pad, H_pad), f32),           # sum_sigma (f32)
                        pltpu.VMEM((N_pad, H_pad), jnp.bfloat16),  # sum_sigma (bf16)
                        pltpu.VMEM((N_pad, H_pad), jnp.bfloat16),  # W_dst(x)+b_dst
                        pltpu.VMEM((N_pad, H_pad), f32)],          # agg accumulator
        compiler_params=pltpu.CompilerParams(
            dimension_semantics=("arbitrary", "arbitrary"),
            vmem_limit_bytes=vmem_limit),
        cost_estimate=pl.CostEstimate(
            flops=8 * E_pad * N_pad * H_pad + 4 * N_pad * H_pad * H_pad
                  + 24 * E_pad * H_pad,
            transcendentals=4 * E_pad * H_pad + N_pad * H_pad,
            bytes_accessed=12 * E_pad * H_pad + 8 * N_pad * H_pad
                           + 8 * H_pad * H_pad + 16 * E_pad),
    )(zw, a_z, b_z, src_p, dst_p, x_p, ws, bs, wd, bd, gn, bnb)

    return node_out[:N, :H], e_hat[:E, :H]


# ---------------------------------------------------------------------------
# Pure-JAX reference (correctness check only)
# ---------------------------------------------------------------------------
def reference(edge_index, x, e, params):
    src = edge_index[0]
    dst = edge_index[1]
    N = x.shape[0]

    def batchnorm(v, gamma, beta):
        mu = jnp.mean(v, axis=0, keepdims=True)
        var = jnp.mean((v - mu) ** 2, axis=0, keepdims=True)
        return (v - mu) / jnp.sqrt(var + BN_EPS) * gamma + beta

    silu = lambda v: v * jax.nn.sigmoid(v)

    zw = (x[src] @ params["wg_s"] + x[dst] @ params["wg_d"]
          + e @ params["wg_e"] + params["bg"])
    e_hat = silu(batchnorm(zw, params["gz"], params["bz"]))

    sigma = jax.nn.sigmoid(e_hat)
    sum_sigma = jax.ops.segment_sum(sigma, src, num_segments=N)
    norm_e = sigma / (sum_sigma[src] + EPSILON)

    src_up = x @ params["ws"] + params["bs"]
    dst_up = (x @ params["wd"] + params["bd"])[dst]
    agg = jax.ops.segment_sum(norm_e * dst_up, src, num_segments=N)
    h = src_up + agg
    node_out = x + silu(batchnorm(h, params["gn"], params["bn"]))
    return node_out, e_hat


# ---------------------------------------------------------------------------
def make_params(key, H):
    ks = jax.random.split(key, 6)
    kw = 1.0 / jnp.sqrt(3.0 * H)   # W_gate: in_features = 3H
    kh = 1.0 / jnp.sqrt(1.0 * H)   # W_src / W_dst: in_features = H
    # Linear weights stored as [in, out] (y = x @ W + b), PyTorch-style U(-k, k)
    return {
        "wg_s": jax.random.uniform(ks[0], (H, H), jnp.float32, -kw, kw),
        "wg_d": jax.random.uniform(ks[1], (H, H), jnp.float32, -kw, kw),
        "wg_e": jax.random.uniform(ks[2], (H, H), jnp.float32, -kw, kw),
        "bg": jax.random.uniform(ks[3], (1, H), jnp.float32, -kw, kw),
        "ws": jax.random.uniform(ks[4], (H, H), jnp.float32, -kh, kh),
        "bs": jnp.zeros((1, H), jnp.float32),
        "wd": jax.random.uniform(ks[5], (H, H), jnp.float32, -kh, kh),
        "bd": jnp.zeros((1, H), jnp.float32),
        # BatchNorm1d default init: weight=1, bias=0
        "gz": jnp.ones((1, H), jnp.float32),
        "bz": jnp.zeros((1, H), jnp.float32),
        "gn": jnp.ones((1, H), jnp.float32),
        "bn": jnp.zeros((1, H), jnp.float32),
    }


def _run_case(N, E, H, tile_e, node_chunk, seed):
    key = jax.random.PRNGKey(seed)
    k1, k2, k3, k4, k5 = jax.random.split(key, 5)
    src = jax.random.randint(k1, (E,), 0, N, dtype=jnp.int32)
    dst = jax.random.randint(k2, (E,), 0, N, dtype=jnp.int32)
    edge_index = jnp.stack([src, dst], axis=0)               # [2, E]
    node_features = jax.random.normal(k3, (N, H), jnp.float32)
    edge_features = jax.random.normal(k4, (E, H), jnp.float32)
    params = make_params(k5, H)

    node_out, edge_out = edge_gated_graph_conv(
        edge_index, node_features, edge_features, params,
        tile_e=tile_e, node_chunk=node_chunk)
    jax.block_until_ready((node_out, edge_out))

    ref_node, ref_edge = reference(edge_index, node_features, edge_features, params)
    assert node_out.shape == (N, H) and edge_out.shape == (E, H)
    # bf16 is used only for the streamed zw, the exact 0/1 one-hots and the
    # gathered/scattered matmul operands (f32 accumulation), so errors stay at
    # the 1e-3..1e-2 level.
    assert jnp.allclose(node_out, ref_node, atol=2e-2, rtol=2e-2), "node mismatch"
    assert jnp.allclose(edge_out, ref_edge, atol=2e-2, rtol=2e-2), "edge mismatch"


if __name__ == "__main__":
    # Case 1: single node chunk; E not a multiple of the edge tile so the
    # padded-edge (sentinel index) path runs.
    _run_case(N=16, E=60, H=32, tile_e=32, node_chunk=256, seed=0)
    # Case 2: forces the multi-chunk node loop (NC=8 -> 3 chunks over N_pad=24)
    # and multiple edge tiles.
    _run_case(N=20, E=100, H=32, tile_e=32, node_chunk=8, seed=1)
    print("KERNEL_OK")
</pallas_src>

<mosaic_0001>
module attributes {stable_mosaic.version = 11 : i64} {
  func.func @_pass1_kernel(%arg0: i32, %arg1: memref<16x128xf32, #tpu.memory_space<vmem>>, %arg2: memref<32x128xf32, #tpu.memory_space<vmem>>, %arg3: memref<32x1xi32, #tpu.memory_space<vmem>>, %arg4: memref<32x1xi32, #tpu.memory_space<vmem>>, %arg5: memref<128x256xf32, #tpu.memory_space<vmem>>, %arg6: memref<128x128xf32, #tpu.memory_space<vmem>>, %arg7: memref<1x128xf32, #tpu.memory_space<vmem>>, %arg8: memref<32x128xbf16, #tpu.memory_space<vmem>>, %arg9: memref<1x128xf32, #tpu.memory_space<vmem>>, %arg10: memref<1x128xf32, #tpu.memory_space<vmem>>, %arg11: memref<16x256xbf16, #tpu.memory_space<vmem>>) attributes {dimension_semantics = [#tpu.dimension_semantics<arbitrary>], iteration_bounds = array<i64: 2>, scalar_prefetch = 0 : i64, scratch_operands = 1 : i64, tpu.core_type = #tpu.core_type<tc>, window_params = [{pipeline_mode = #tpu.pipeline_mode<synchronous>, transform_indices = @transform_0, window_bounds = array<i64: 16, 128>}, {transform_indices = @transform_1, window_bounds = array<i64: 32, 128>}, {transform_indices = @transform_2, window_bounds = array<i64: 32, 1>}, {transform_indices = @transform_3, window_bounds = array<i64: 32, 1>}, {pipeline_mode = #tpu.pipeline_mode<synchronous>, transform_indices = @transform_4, window_bounds = array<i64: 128, 256>}, {pipeline_mode = #tpu.pipeline_mode<synchronous>, transform_indices = @transform_5, window_bounds = array<i64: 128, 128>}, {pipeline_mode = #tpu.pipeline_mode<synchronous>, transform_indices = @transform_6, window_bounds = array<i64: 1, 128>}, {transform_indices = @transform_7, window_bounds = array<i64: 32, 128>}, {pipeline_mode = #tpu.pipeline_mode<synchronous>, transform_indices = @transform_8, window_bounds = array<i64: 1, 128>}, {pipeline_mode = #tpu.pipeline_mode<synchronous>, transform_indices = @transform_9, window_bounds = array<i64: 1, 128>}]} {
    %c0_i32 = arith.constant 0 : i32
    %0 = arith.cmpi eq, %arg0, %c0_i32 : i32
    %1 = arith.extui %0 : i1 to i32
    %c0_i32_0 = arith.constant 0 : i32
    %2 = arith.cmpi ne, %1, %c0_i32_0 : i32
    scf.if %2 {
      %c0_34 = arith.constant 0 : index
      %c0_35 = arith.constant 0 : index
      %58 = vector.load %arg1[%c0_34, %c0_35] : memref<16x128xf32, #tpu.memory_space<vmem>>, vector<16x128xf32>
      %c0_36 = arith.constant 0 : index
      %c0_37 = arith.constant 0 : index
      %59 = vector.load %arg5[%c0_36, %c0_37] : memref<128x256xf32, #tpu.memory_space<vmem>>, vector<128x256xf32>
      %cst_38 = arith.constant dense<0.000000e+00> : vector<16x256xf32>
      %60 = tpu.matmul %58, %59, %cst_38 {dimension_numbers = #tpu.dot_dimension_numbers<[1], [0], [0], [1], [0, 0, 1, 1], [], []>} : vector<16x128xf32>, vector<128x256xf32>, vector<16x256xf32> -> vector<16x256xf32>
      %61 = arith.truncf %60 : vector<16x256xf32> to vector<16x256xbf16>
      %c0_39 = arith.constant 0 : index
      %c0_40 = arith.constant 0 : index
      %62 = vector.load %arg11[%c0_39, %c0_40] : memref<16x256xbf16, #tpu.memory_space<vmem>>, vector<16x256xbf16>
      tpu.vector_store %arg11[%c0_39, %c0_40], %61 {strides = array<i32>} : memref<16x256xbf16, #tpu.memory_space<vmem>>, vector<16x256xbf16>,
      %cst_41 = arith.constant 0.000000e+00 : f32
      %63 = vector.broadcast %cst_41 : f32 to vector<1x128xf32>
      %c0_42 = arith.constant 0 : index
      %c0_43 = arith.constant 0 : index
      %64 = vector.load %arg9[%c0_42, %c0_43] : memref<1x128xf32, #tpu.memory_space<vmem>>, vector<1x128xf32>
      tpu.vector_store %arg9[%c0_42, %c0_43], %63 {strides = array<i32>} : memref<1x128xf32, #tpu.memory_space<vmem>>, vector<1x128xf32>,
      %cst_44 = arith.constant 0.000000e+00 : f32
      %65 = vector.broadcast %cst_44 : f32 to vector<1x128xf32>
      %c0_45 = arith.constant 0 : index
      %c0_46 = arith.constant 0 : index
      %66 = vector.load %arg10[%c0_45, %c0_46] : memref<1x128xf32, #tpu.memory_space<vmem>>, vector<1x128xf32>
      tpu.vector_store %arg10[%c0_45, %c0_46], %65 {strides = array<i32>} : memref<1x128xf32, #tpu.memory_space<vmem>>, vector<1x128xf32>,
    } else {
    }
    %c0 = arith.constant 0 : index
    %c0_1 = arith.constant 0 : index
    %3 = vector.load %arg3[%c0, %c0_1] : memref<32x1xi32, #tpu.memory_space<vmem>>, vector<32x1xi32>
    %c0_2 = arith.constant 0 : index
    %c0_3 = arith.constant 0 : index
    %4 = vector.load %arg4[%c0_2, %c0_3] : memref<32x1xi32, #tpu.memory_space<vmem>>, vector<32x1xi32>
    %c0_4 = arith.constant 0 : index
    %c0_5 = arith.constant 0 : index
    %5 = vector.load %arg2[%c0_4, %c0_5] : memref<32x128xf32, #tpu.memory_space<vmem>>, vector<32x128xf32>
    %c0_6 = arith.constant 0 : index
    %c0_7 = arith.constant 0 : index
    %6 = vector.load %arg6[%c0_6, %c0_7] : memref<128x128xf32, #tpu.memory_space<vmem>>, vector<128x128xf32>
    %cst = arith.constant dense<0.000000e+00> : vector<32x128xf32>
    %7 = tpu.matmul %5, %6, %cst {dimension_numbers = #tpu.dot_dimension_numbers<[1], [0], [0], [1], [0, 0, 1, 1], [], []>} : vector<32x128xf32>, vector<128x128xf32>, vector<32x128xf32> -> vector<32x128xf32>
    %c0_8 = arith.constant 0 : index
    %c0_9 = arith.constant 0 : index
    %8 = vector.load %arg7[%c0_8, %c0_9] : memref<1x128xf32, #tpu.memory_space<vmem>>, vector<1x128xf32>
    %9 = vector.broadcast %8 : vector<1x128xf32> to vector<32x128xf32>
    %10 = arith.addf %7, %9 : vector<32x128xf32>
    %11 = tpu.iota {dimensions = array<i32: 1>} : vector<32x16xi32>
    %c0_i32_10 = arith.constant 0 : i32
    %12 = vector.broadcast %c0_i32_10 : i32 to vector<32x16xi32>
    %13 = arith.addi %12, %11 : vector<32x16xi32>
    %14 = vector.broadcast %3 : vector<32x1xi32> to vector<32x16xi32>
    %15 = arith.cmpi eq, %14, %13 : vector<32x16xi32>
    %cst_11 = arith.constant 1.000000e+00 : f32
    %cst_12 = arith.constant 0.000000e+00 : f32
    %16 = vector.broadcast %cst_11 : f32 to vector<32x16xf32>
    %17 = vector.broadcast %cst_12 : f32 to vector<32x16xf32>
    %18 = arith.select %15, %16, %17 : vector<32x16xi1>, vector<32x16xf32>
    %19 = arith.truncf %18 : vector<32x16xf32> to vector<32x16xbf16>
    %20 = tpu.iota {dimensions = array<i32: 1>} : vector<32x16xi32>
    %c0_i32_13 = arith.constant 0 : i32
    %21 = vector.broadcast %c0_i32_13 : i32 to vector<32x16xi32>
    %22 = arith.addi %21, %20 : vector<32x16xi32>
    %23 = vector.broadcast %4 : vector<32x1xi32> to vector<32x16xi32>
    %24 = arith.cmpi eq, %23, %22 : vector<32x16xi32>
    %cst_14 = arith.constant 1.000000e+00 : f32
    %cst_15 = arith.constant 0.000000e+00 : f32
    %25 = vector.broadcast %cst_14 : f32 to vector<32x16xf32>
    %26 = vector.broadcast %cst_15 : f32 to vector<32x16xf32>
    %27 = arith.select %24, %25, %26 : vector<32x16xi1>, vector<32x16xf32>
    %28 = arith.truncf %27 : vector<32x16xf32> to vector<32x16xbf16>
    %c0_16 = arith.constant 0 : index
    %c0_17 = arith.constant 0 : index
    %29 = vector.load %arg11[%c0_16, %c0_17] : memref<16x256xbf16, #tpu.memory_space<vmem>>, vector<16x128xbf16>
    %cst_18 = arith.constant dense<0.000000e+00> : vector<32x128xf32>
    %30 = tpu.matmul %19, %29, %cst_18 {dimension_numbers = #tpu.dot_dimension_numbers<[1], [0], [0], [1], [0, 0, 1, 1], [], []>} : vector<32x16xbf16>, vector<16x128xbf16>, vector<32x128xf32> -> vector<32x128xf32>
    %31 = arith.addf %10, %30 : vector<32x128xf32>
    %c0_19 = arith.constant 0 : index
    %c128 = arith.constant 128 : index
    %32 = vector.load %arg11[%c0_19, %c128] : memref<16x256xbf16, #tpu.memory_space<vmem>>, vector<16x128xbf16>
    %cst_20 = arith.constant dense<0.000000e+00> : vector<32x128xf32>
    %33 = tpu.matmul %28, %32, %cst_20 {dimension_numbers = #tpu.dot_dimension_numbers<[1], [0], [0], [1], [0, 0, 1, 1], [], []>} : vector<32x16xbf16>, vector<16x128xbf16>, vector<32x128xf32> -> vector<32x128xf32>
    %34 = arith.addf %31, %33 : vector<32x128xf32>
    %35 = arith.truncf %34 : vector<32x128xf32> to vector<32x128xbf16>
    %c0_21 = arith.constant 0 : index
    %c0_22 = arith.constant 0 : index
    %36 = vector.load %arg8[%c0_21, %c0_22] : memref<32x128xbf16, #tpu.memory_space<vmem>>, vector<32x128xbf16>
    tpu.vector_store %arg8[%c0_21, %c0_22], %35 {strides = array<i32>} : memref<32x128xbf16, #tpu.memory_space<vmem>>, vector<32x128xbf16>,
    %c32_i32 = arith.constant 32 : i32
    %37 = arith.muli %arg0, %c32_i32 : i32
    %38 = tpu.iota {dimensions = array<i32: 0>} : vector<32x1xi32>
    %39 = vector.broadcast %37 : i32 to vector<32x1xi32>
    %40 = arith.addi %39, %38 : vector<32x1xi32>
    %c60_i32 = arith.constant 60 : i32
    %41 = vector.broadcast %c60_i32 : i32 to vector<32x1xi32>
    %42 = arith.cmpi slt, %40, %41 : vector<32x1xi32>
    %cst_23 = arith.constant 0.000000e+00 : f32
    %43 = vector.shape_cast %42 : vector<32x1xi1> to vector<32x1xi1>
    %44 = vector.broadcast %43 : vector<32x1xi1> to vector<32x128xi1>
    %45 = vector.broadcast %cst_23 : f32 to vector<32x128xf32>
    %46 = arith.select %44, %34, %45 : vector<32x128xi1>, vector<32x128xf32>
    %c0_24 = arith.constant 0 : index
    %c0_25 = arith.constant 0 : index
    %47 = vector.load %arg9[%c0_24, %c0_25] : memref<1x128xf32, #tpu.memory_space<vmem>>, vector<1x128xf32>
    %cst_26 = arith.constant dense<0.000000e+00> : vector<128xf32>
    %48 = vector.multi_reduction <add>, %46, %cst_26 [0] : vector<32x128xf32> to vector<128xf32>
    %49 = vector.shape_cast %48 : vector<128xf32> to vector<1x128xf32>
    %50 = arith.addf %47, %49 : vector<1x128xf32>
    %c0_27 = arith.constant 0 : index
    %c0_28 = arith.constant 0 : index
    %51 = vector.load %arg9[%c0_27, %c0_28] : memref<1x128xf32, #tpu.memory_space<vmem>>, vector<1x128xf32>
    tpu.vector_store %arg9[%c0_27, %c0_28], %50 {strides = array<i32>} : memref<1x128xf32, #tpu.memory_space<vmem>>, vector<1x128xf32>,
    %c0_29 = arith.constant 0 : index
    %c0_30 = arith.constant 0 : index
    %52 = vector.load %arg10[%c0_29, %c0_30] : memref<1x128xf32, #tpu.memory_space<vmem>>, vector<1x128xf32>
    %53 = arith.mulf %46, %34 : vector<32x128xf32>
    %cst_31 = arith.constant dense<0.000000e+00> : vector<128xf32>
    %54 = vector.multi_reduction <add>, %53, %cst_31 [0] : vector<32x128xf32> to vector<128xf32>
    %55 = vector.shape_cast %54 : vector<128xf32> to vector<1x128xf32>
    %56 = arith.addf %52, %55 : vector<1x128xf32>
    %c0_32 = arith.constant 0 : index
    %c0_33 = arith.constant 0 : index
    %57 = vector.load %arg10[%c0_32, %c0_33] : memref<1x128xf32, #tpu.memory_space<vmem>>, vector<1x128xf32>
    tpu.vector_store %arg10[%c0_32, %c0_33], %56 {strides = array<i32>} : memref<1x128xf32, #tpu.memory_space<vmem>>, vector<1x128xf32>,
    return
  }
  func.func @transform_0(%arg0: i32) -> (i32, i32) {
    %c0_i32 = arith.constant 0 : i32
    %c0_i32_0 = arith.constant 0 : i32
    %c0_i32_1 = arith.constant 0 : i32
    return %c0_i32, %c0_i32_0 : i32, i32
  }
  func.func @transform_1(%arg0: i32) -> (i32, i32) {
    %c0_i32 = arith.constant 0 : i32
    %c0_i32_0 = arith.constant 0 : i32
    return %arg0, %c0_i32 : i32, i32
  }
  func.func @transform_2(%arg0: i32) -> (i32, i32) {
    %c0_i32 = arith.constant 0 : i32
    %c0_i32_0 = arith.constant 0 : i32
    return %arg0, %c0_i32 : i32, i32
  }
  func.func @transform_3(%arg0: i32) -> (i32, i32) {
    %c0_i32 = arith.constant 0 : i32
    %c0_i32_0 = arith.constant 0 : i32
    return %arg0, %c0_i32 : i32, i32
  }
  func.func @transform_4(%arg0: i32) -> (i32, i32) {
    %c0_i32 = arith.constant 0 : i32
    %c0_i32_0 = arith.constant 0 : i32
    %c0_i32_1 = arith.constant 0 : i32
    return %c0_i32, %c0_i32_0 : i32, i32
  }
  func.func @transform_5(%arg0: i32) -> (i32, i32) {
    %c0_i32 = arith.constant 0 : i32
    %c0_i32_0 = arith.constant 0 : i32
    %c0_i32_1 = arith.constant 0 : i32
    return %c0_i32, %c0_i32_0 : i32, i32
  }
  func.func @transform_6(%arg0: i32) -> (i32, i32) {
    %c0_i32 = arith.constant 0 : i32
    %c0_i32_0 = arith.constant 0 : i32
    %c0_i32_1 = arith.constant 0 : i32
    return %c0_i32, %c0_i32_0 : i32, i32
  }
  func.func @transform_7(%arg0: i32) -> (i32, i32) {
    %c0_i32 = arith.constant 0 : i32
    %c0_i32_0 = arith.constant 0 : i32
    return %arg0, %c0_i32 : i32, i32
  }
  func.func @transform_8(%arg0: i32) -> (i32, i32) {
    %c0_i32 = arith.constant 0 : i32
    %c0_i32_0 = arith.constant 0 : i32
    %c0_i32_1 = arith.constant 0 : i32
    return %c0_i32, %c0_i32_0 : i32, i32
  }
  func.func @transform_9(%arg0: i32) -> (i32, i32) {
    %c0_i32 = arith.constant 0 : i32
    %c0_i32_0 = arith.constant 0 : i32
    %c0_i32_1 = arith.constant 0 : i32
    return %c0_i32, %c0_i32_0 : i32, i32
  }
}

module attributes {stable_mosaic.version = 11 : i64} {
  func.func @_pass23_kernel(%arg0: i32, %arg1: i32, %arg2: memref<32x128xbf16, #tpu.memory_space<vmem>>, %arg3: memref<1x128xf32, #tpu.memory_space<vmem>>, %arg4: memref<1x128xf32, #tpu.memory_space<vmem>>, %arg5: memref<32x1xi32, #tpu.memory_space<vmem>>, %arg6: memref<32x1xi32, #tpu.memory_space<vmem>>, %arg7: memref<16x128xf32, #tpu.memory_space<vmem>>, %arg8: memref<128x128xf32, #tpu.memory_space<vmem>>, %arg9: memref<1x128xf32, #tpu.memory_space<vmem>>, %arg10: memref<128x128xf32, #tpu.memory_space<vmem>>, %arg11: memref<1x128xf32, #tpu.memory_space<vmem>>, %arg12: memref<1x128xf32, #tpu.memory_space<vmem>>, %arg13: memref<1x128xf32, #tpu.memory_space<vmem>>, %arg14: memref<32x128xf32, #tpu.memory_space<vmem>>, %arg15: memref<16x128xf32, #tpu.memory_space<vmem>>, %arg16: memref<16x128xf32, #tpu.memory_space<vmem>>, %arg17: memref<16x128xbf16, #tpu.memory_space<vmem>>, %arg18: memref<16x128xbf16, #tpu.memory_space<vmem>>, %arg19: memref<16x128xf32, #tpu.memory_space<vmem>>) attributes {dimension_semantics = [#tpu.dimension_semantics<arbitrary>, #tpu.dimension_semantics<arbitrary>], iteration_bounds = array<i64: 2, 2>, scalar_prefetch = 0 : i64, scratch_operands = 4 : i64, tpu.core_type = #tpu.core_type<tc>, window_params = [{transform_indices = @transform_0, window_bounds = array<i64: 32, 128>}, {pipeline_mode = #tpu.pipeline_mode<synchronous>, transform_indices = @transform_1, window_bounds = array<i64: 1, 128>}, {pipeline_mode = #tpu.pipeline_mode<synchronous>, transform_indices = @transform_2, window_bounds = array<i64: 1, 128>}, {transform_indices = @transform_3, window_bounds = array<i64: 32, 1>}, {transform_indices = @transform_4, window_bounds = array<i64: 32, 1>}, {pipeline_mode = #tpu.pipeline_mode<synchronous>, transform_indices = @transform_5, window_bounds = array<i64: 16, 128>}, {pipeline_mode = #tpu.pipeline_mode<synchronous>, transform_indices = @transform_6, window_bounds = array<i64: 128, 128>}, {pipeline_mode = #tpu.pipeline_mode<synchronous>, transform_indices = @transform_7, window_bounds = array<i64: 1, 128>}, {pipeline_mode = #tpu.pipeline_mode<synchronous>, transform_indices = @transform_8, window_bounds = array<i64: 128, 128>}, {pipeline_mode = #tpu.pipeline_mode<synchronous>, transform_indices = @transform_9, window_bounds = array<i64: 1, 128>}, {pipeline_mode = #tpu.pipeline_mode<synchronous>, transform_indices = @transform_10, window_bounds = array<i64: 1, 128>}, {pipeline_mode = #tpu.pipeline_mode<synchronous>, transform_indices = @transform_11, window_bounds = array<i64: 1, 128>}, {transform_indices = @transform_12, window_bounds = array<i64: 32, 128>}, {pipeline_mode = #tpu.pipeline_mode<synchronous>, transform_indices = @transform_13, window_bounds = array<i64: 16, 128>}]} {
    %c0 = arith.constant 0 : index
    %c0_0 = arith.constant 0 : index
    %0 = vector.load %arg5[%c0, %c0_0] : memref<32x1xi32, #tpu.memory_space<vmem>>, vector<32x1xi32>
    %c0_1 = arith.constant 0 : index
    %c0_2 = arith.constant 0 : index
    %1 = vector.load %arg6[%c0_1, %c0_2] : memref<32x1xi32, #tpu.memory_space<vmem>>, vector<32x1xi32>
    %c0_3 = arith.constant 0 : index
    %c0_4 = arith.constant 0 : index
    %2 = vector.load %arg2[%c0_3, %c0_4] : memref<32x128xbf16, #tpu.memory_space<vmem>>, vector<32x128xbf16>
    %3 = arith.extf %2 : vector<32x128xbf16> to vector<32x128xf32>
    %c0_5 = arith.constant 0 : index
    %c0_6 = arith.constant 0 : index
    %4 = vector.load %arg3[%c0_5, %c0_6] : memref<1x128xf32, #tpu.memory_space<vmem>>, vector<1x128xf32>
    %5 = vector.broadcast %4 : vector<1x128xf32> to vector<32x128xf32>
    %6 = arith.mulf %3, %5 : vector<32x128xf32>
    %c0_7 = arith.constant 0 : index
    %c0_8 = arith.constant 0 : index
    %7 = vector.load %arg4[%c0_7, %c0_8] : memref<1x128xf32, #tpu.memory_space<vmem>>, vector<1x128xf32>
    %8 = vector.broadcast %7 : vector<1x128xf32> to vector<32x128xf32>
    %9 = arith.addf %6, %8 : vector<32x128xf32>
    %10 = arith.negf %9 : vector<32x128xf32>
    %11 = math.exp %10 : vector<32x128xf32>
    %cst = arith.constant 1.000000e+00 : f32
    %12 = vector.broadcast %cst : f32 to vector<32x128xf32>
    %13 = arith.addf %12, %11 : vector<32x128xf32>
    %14 = arith.divf %12, %13 : vector<32x128xf32>
    %15 = arith.mulf %9, %14 : vector<32x128xf32>
    %c0_9 = arith.constant 0 : index
    %c0_10 = arith.constant 0 : index
    %16 = vector.load %arg14[%c0_9, %c0_10] : memref<32x128xf32, #tpu.memory_space<vmem>>, vector<32x128xf32>
    tpu.vector_store %arg14[%c0_9, %c0_10], %15 {strides = array<i32>} : memref<32x128xf32, #tpu.memory_space<vmem>>, vector<32x128xf32>,
    %17 = arith.negf %15 : vector<32x128xf32>
    %18 = math.exp %17 : vector<32x128xf32>
    %cst_11 = arith.constant 1.000000e+00 : f32
    %19 = vector.broadcast %cst_11 : f32 to vector<32x128xf32>
    %20 = arith.addf %19, %18 : vector<32x128xf32>
    %21 = arith.divf %19, %20 : vector<32x128xf32>
    %22 = arith.truncf %21 : vector<32x128xf32> to vector<32x128xbf16>
    %c0_i32 = arith.constant 0 : i32
    %23 = arith.cmpi eq, %arg0, %c0_i32 : i32
    %c0_i32_12 = arith.constant 0 : i32
    %24 = arith.cmpi eq, %arg1, %c0_i32_12 : i32
    %25 = arith.andi %23, %24 : i1
    %26 = arith.extui %25 : i1 to i32
    %c0_i32_13 = arith.constant 0 : i32
    %27 = arith.cmpi ne, %26, %c0_i32_13 : i32
    scf.if %27 {
      %cst_23 = arith.constant 0.000000e+00 : f32
      %44 = vector.broadcast %cst_23 : f32 to vector<16x128xf32>
      %c0_24 = arith.constant 0 : index
      %c0_25 = arith.constant 0 : index
      %45 = vector.load %arg16[%c0_24, %c0_25] : memref<16x128xf32, #tpu.memory_space<vmem>>, vector<16x128xf32>
      tpu.vector_store %arg16[%c0_24, %c0_25], %44 {strides = array<i32>} : memref<16x128xf32, #tpu.memory_space<vmem>>, vector<16x128xf32>,
      %c0_26 = arith.constant 0 : index
      %c0_27 = arith.constant 0 : index
      %46 = vector.load %arg7[%c0_26, %c0_27] : memref<16x128xf32, #tpu.memory_space<vmem>>, vector<16x128xf32>
      %c0_28 = arith.constant 0 : index
      %c0_29 = arith.constant 0 : index
      %47 = vector.load %arg10[%c0_28, %c0_29] : memref<128x128xf32, #tpu.memory_space<vmem>>, vector<128x128xf32>
      %cst_30 = arith.constant dense<0.000000e+00> : vector<16x128xf32>
      %48 = tpu.matmul %46, %47, %cst_30 {dimension_numbers = #tpu.dot_dimension_numbers<[1], [0], [0], [1], [0, 0, 1, 1], [], []>} : vector<16x128xf32>, vector<128x128xf32>, vector<16x128xf32> -> vector<16x128xf32>
      %c0_31 = arith.constant 0 : index
      %c0_32 = arith.constant 0 : index
      %49 = vector.load %arg11[%c0_31, %c0_32] : memref<1x128xf32, #tpu.memory_space<vmem>>, vector<1x128xf32>
      %50 = vector.broadcast %49 : vector<1x128xf32> to vector<16x128xf32>
      %51 = arith.addf %48, %50 : vector<16x128xf32>
      %52 = arith.truncf %51 : vector<16x128xf32> to vector<16x128xbf16>
      %c0_33 = arith.constant 0 : index
      %c0_34 = arith.constant 0 : index
      %53 = vector.load %arg18[%c0_33, %c0_34] : memref<16x128xbf16, #tpu.memory_space<vmem>>, vector<16x128xbf16>
      tpu.vector_store %arg18[%c0_33, %c0_34], %52 {strides = array<i32>} : memref<16x128xbf16, #tpu.memory_space<vmem>>, vector<16x128xbf16>,
    } else {
    }
    %c0_i32_14 = arith.constant 0 : i32
    %28 = arith.cmpi eq, %arg0, %c0_i32_14 : i32
    %29 = arith.extui %28 : i1 to i32
    %c0_i32_15 = arith.constant 0 : i32
    %30 = arith.cmpi ne, %29, %c0_i32_15 : i32
    scf.if %30 {
      %44 = tpu.iota {dimensions = array<i32: 1>} : vector<32x16xi32>
      %c0_i32_23 = arith.constant 0 : i32
      %45 = vector.broadcast %c0_i32_23 : i32 to vector<32x16xi32>
      %46 = arith.addi %45, %44 : vector<32x16xi32>
      %47 = vector.broadcast %0 : vector<32x1xi32> to vector<32x16xi32>
      %48 = arith.cmpi eq, %47, %46 : vector<32x16xi32>
      %cst_24 = arith.constant 1.000000e+00 : f32
      %cst_25 = arith.constant 0.000000e+00 : f32
      %49 = vector.broadcast %cst_24 : f32 to vector<32x16xf32>
      %50 = vector.broadcast %cst_25 : f32 to vector<32x16xf32>
      %51 = arith.select %48, %49, %50 : vector<32x16xi1>, vector<32x16xf32>
      %52 = arith.truncf %51 : vector<32x16xf32> to vector<32x16xbf16>
      %c0_26 = arith.constant 0 : index
      %c0_27 = arith.constant 0 : index
      %53 = vector.load %arg16[%c0_26, %c0_27] : memref<16x128xf32, #tpu.memory_space<vmem>>, vector<16x128xf32>
      %cst_28 = arith.constant dense<0.000000e+00> : vector<16x128xf32>
      %54 = tpu.matmul %52, %22, %cst_28 {dimension_numbers = #tpu.dot_dimension_numbers<[0], [0], [1], [1], [0, 1, 1, 1], [], []>} : vector<32x16xbf16>, vector<32x128xbf16>, vector<16x128xf32> -> vector<16x128xf32>
      %55 = arith.addf %53, %54 : vector<16x128xf32>
      %c0_29 = arith.constant 0 : index
      %c0_30 = arith.constant 0 : index
      %56 = vector.load %arg16[%c0_29, %c0_30] : memref<16x128xf32, #tpu.memory_space<vmem>>, vector<16x128xf32>
      tpu.vector_store %arg16[%c0_29, %c0_30], %55 {strides = array<i32>} : memref<16x128xf32, #tpu.memory_space<vmem>>, vector<16x128xf32>,
    } else {
    }
    %c1_i32 = arith.constant 1 : i32
    %31 = arith.cmpi eq, %arg0, %c1_i32 : i32
    %c0_i32_16 = arith.constant 0 : i32
    %32 = arith.cmpi eq, %arg1, %c0_i32_16 : i32
    %33 = arith.andi %31, %32 : i1
    %34 = arith.extui %33 : i1 to i32
    %c0_i32_17 = arith.constant 0 : i32
    %35 = arith.cmpi ne, %34, %c0_i32_17 : i32
    scf.if %35 {
      %c0_23 = arith.constant 0 : index
      %c0_24 = arith.constant 0 : index
      %44 = vector.load %arg16[%c0_23, %c0_24] : memref<16x128xf32, #tpu.memory_space<vmem>>, vector<16x128xf32>
      %45 = arith.truncf %44 : vector<16x128xf32> to vector<16x128xbf16>
      %c0_25 = arith.constant 0 : index
      %c0_26 = arith.constant 0 : index
      %46 = vector.load %arg17[%c0_25, %c0_26] : memref<16x128xbf16, #tpu.memory_space<vmem>>, vector<16x128xbf16>
      tpu.vector_store %arg17[%c0_25, %c0_26], %45 {strides = array<i32>} : memref<16x128xbf16, #tpu.memory_space<vmem>>, vector<16x128xbf16>,
      %cst_27 = arith.constant 0.000000e+00 : f32
      %47 = vector.broadcast %cst_27 : f32 to vector<16x128xf32>
      %c0_28 = arith.constant 0 : index
      %c0_29 = arith.constant 0 : index
      %48 = vector.load %arg19[%c0_28, %c0_29] : memref<16x128xf32, #tpu.memory_space<vmem>>, vector<16x128xf32>
      tpu.vector_store %arg19[%c0_28, %c0_29], %47 {strides = array<i32>} : memref<16x128xf32, #tpu.memory_space<vmem>>, vector<16x128xf32>,
    } else {
    }
    %c1_i32_18 = arith.constant 1 : i32
    %36 = arith.cmpi eq, %arg0, %c1_i32_18 : i32
    %37 = arith.extui %36 : i1 to i32
    %c0_i32_19 = arith.constant 0 : i32
    %38 = arith.cmpi ne, %37, %c0_i32_19 : i32
    scf.if %38 {
      %cst_23 = arith.constant 0.000000e+00 : f32
      %44 = vector.broadcast %cst_23 : f32 to vector<32x128xf32>
      %cst_24 = arith.constant 0.000000e+00 : f32
      %45 = vector.broadcast %cst_24 : f32 to vector<32x128xf32>
      %46 = tpu.iota {dimensions = array<i32: 1>} : vector<32x16xi32>
      %c0_i32_25 = arith.constant 0 : i32
      %47 = vector.broadcast %c0_i32_25 : i32 to vector<32x16xi32>
      %48 = arith.addi %47, %46 : vector<32x16xi32>
      %49 = vector.broadcast %0 : vector<32x1xi32> to vector<32x16xi32>
      %50 = arith.cmpi eq, %49, %48 : vector<32x16xi32>
      %cst_26 = arith.constant 1.000000e+00 : f32
      %cst_27 = arith.constant 0.000000e+00 : f32
      %51 = vector.broadcast %cst_26 : f32 to vector<32x16xf32>
      %52 = vector.broadcast %cst_27 : f32 to vector<32x16xf32>
      %53 = arith.select %50, %51, %52 : vector<32x16xi1>, vector<32x16xf32>
      %54 = arith.truncf %53 : vector<32x16xf32> to vector<32x16xbf16>
      %55 = tpu.iota {dimensions = array<i32: 1>} : vector<32x16xi32>
      %c0_i32_28 = arith.constant 0 : i32
      %56 = vector.broadcast %c0_i32_28 : i32 to vector<32x16xi32>
      %57 = arith.addi %56, %55 : vector<32x16xi32>
      %58 = vector.broadcast %1 : vector<32x1xi32> to vector<32x16xi32>
      %59 = arith.cmpi eq, %58, %57 : vector<32x16xi32>
      %cst_29 = arith.constant 1.000000e+00 : f32
      %cst_30 = arith.constant 0.000000e+00 : f32
      %60 = vector.broadcast %cst_29 : f32 to vector<32x16xf32>
      %61 = vector.broadcast %cst_30 : f32 to vector<32x16xf32>
      %62 = arith.select %59, %60, %61 : vector<32x16xi1>, vector<32x16xf32>
      %63 = arith.truncf %62 : vector<32x16xf32> to vector<32x16xbf16>
      %c0_31 = arith.constant 0 : index
      %c0_32 = arith.constant 0 : index
      %64 = vector.load %arg17[%c0_31, %c0_32] : memref<16x128xbf16, #tpu.memory_space<vmem>>, vector<16x128xbf16>
      %cst_33 = arith.constant dense<0.000000e+00> : vector<32x128xf32>
      %65 = tpu.matmul %54, %64, %cst_33 {dimension_numbers = #tpu.dot_dimension_numbers<[1], [0], [0], [1], [0, 0, 1, 1], [], []>} : vector<32x16xbf16>, vector<16x128xbf16>, vector<32x128xf32> -> vector<32x128xf32>
      %66 = arith.addf %44, %65 : vector<32x128xf32>
      %c0_34 = arith.constant 0 : index
      %c0_35 = arith.constant 0 : index
      %67 = vector.load %arg18[%c0_34, %c0_35] : memref<16x128xbf16, #tpu.memory_space<vmem>>, vector<16x128xbf16>
      %cst_36 = arith.constant dense<0.000000e+00> : vector<32x128xf32>
      %68 = tpu.matmul %63, %67, %cst_36 {dimension_numbers = #tpu.dot_dimension_numbers<[1], [0], [0], [1], [0, 0, 1, 1], [], []>} : vector<32x16xbf16>, vector<16x128xbf16>, vector<32x128xf32> -> vector<32x128xf32>
      %69 = arith.addf %45, %68 : vector<32x128xf32>
      %cst_37 = arith.constant 9.99999997E-7 : f32
      %70 = vector.broadcast %cst_37 : f32 to vector<32x128xf32>
      %71 = arith.addf %66, %70 : vector<32x128xf32>
      %72 = tpu.reciprocal %71 {approx = true} : vector<32x128xf32> -> vector<32x128xf32>
      %73 = arith.mulf %21, %72 : vector<32x128xf32>
      %74 = arith.mulf %73, %69 : vector<32x128xf32>
      %75 = arith.truncf %74 : vector<32x128xf32> to vector<32x128xbf16>
      %76 = tpu.iota {dimensions = array<i32: 1>} : vector<32x16xi32>
      %c0_i32_38 = arith.constant 0 : i32
      %77 = vector.broadcast %c0_i32_38 : i32 to vector<32x16xi32>
      %78 = arith.addi %77, %76 : vector<32x16xi32>
      %79 = vector.broadcast %0 : vector<32x1xi32> to vector<32x16xi32>
      %80 = arith.cmpi eq, %79, %78 : vector<32x16xi32>
      %cst_39 = arith.constant 1.000000e+00 : f32
      %cst_40 = arith.constant 0.000000e+00 : f32
      %81 = vector.broadcast %cst_39 : f32 to vector<32x16xf32>
      %82 = vector.broadcast %cst_40 : f32 to vector<32x16xf32>
      %83 = arith.select %80, %81, %82 : vector<32x16xi1>, vector<32x16xf32>
      %84 = arith.truncf %83 : vector<32x16xf32> to vector<32x16xbf16>
      %c0_41 = arith.constant 0 : index
      %c0_42 = arith.constant 0 : index
      %85 = vector.load %arg19[%c0_41, %c0_42] : memref<16x128xf32, #tpu.memory_space<vmem>>, vector<16x128xf32>
      %cst_43 = arith.constant dense<0.000000e+00> : vector<16x128xf32>
      %86 = tpu.matmul %84, %75, %cst_43 {dimension_numbers = #tpu.dot_dimension_numbers<[0], [0], [1], [1], [0, 1, 1, 1], [], []>} : vector<32x16xbf16>, vector<32x128xbf16>, vector<16x128xf32> -> vector<16x128xf32>
      %87 = arith.addf %85, %86 : vector<16x128xf32>
      %c0_44 = arith.constant 0 : index
      %c0_45 = arith.constant 0 : index
      %88 = vector.load %arg19[%c0_44, %c0_45] : memref<16x128xf32, #tpu.memory_space<vmem>>, vector<16x128xf32>
      tpu.vector_store %arg19[%c0_44, %c0_45], %87 {strides = array<i32>} : memref<16x128xf32, #tpu.memory_space<vmem>>, vector<16x128xf32>,
    } else {
    }
    %c1_i32_20 = arith.constant 1 : i32
    %39 = arith.cmpi eq, %arg0, %c1_i32_20 : i32
    %c1_i32_21 = arith.constant 1 : i32
    %40 = arith.cmpi eq, %arg1, %c1_i32_21 : i32
    %41 = arith.andi %39, %40 : i1
    %42 = arith.extui %41 : i1 to i32
    %c0_i32_22 = arith.constant 0 : i32
    %43 = arith.cmpi ne, %42, %c0_i32_22 : i32
    scf.if %43 {
      %c0_23 = arith.constant 0 : index
      %c0_24 = arith.constant 0 : index
      %44 = vector.load %arg7[%c0_23, %c0_24] : memref<16x128xf32, #tpu.memory_space<vmem>>, vector<16x128xf32>
      %c0_25 = arith.constant 0 : index
      %c0_26 = arith.constant 0 : index
      %45 = vector.load %arg8[%c0_25, %c0_26] : memref<128x128xf32, #tpu.memory_space<vmem>>, vector<128x128xf32>
      %cst_27 = arith.constant dense<0.000000e+00> : vector<16x128xf32>
      %46 = tpu.matmul %44, %45, %cst_27 {dimension_numbers = #tpu.dot_dimension_numbers<[1], [0], [0], [1], [0, 0, 1, 1], [], []>} : vector<16x128xf32>, vector<128x128xf32>, vector<16x128xf32> -> vector<16x128xf32>
      %c0_28 = arith.constant 0 : index
      %c0_29 = arith.constant 0 : index
      %47 = vector.load %arg9[%c0_28, %c0_29] : memref<1x128xf32, #tpu.memory_space<vmem>>, vector<1x128xf32>
      %48 = vector.broadcast %47 : vector<1x128xf32> to vector<16x128xf32>
      %49 = arith.addf %46, %48 : vector<16x128xf32>
      %c0_30 = arith.constant 0 : index
      %c0_31 = arith.constant 0 : index
      %50 = vector.load %arg19[%c0_30, %c0_31] : memref<16x128xf32, #tpu.memory_space<vmem>>, vector<16x128xf32>
      %51 = arith.addf %49, %50 : vector<16x128xf32>
      %cst_32 = arith.constant dense<0.000000e+00> : vector<128xf32>
      %52 = vector.multi_reduction <add>, %51, %cst_32 [0] : vector<16x128xf32> to vector<128xf32>
      %53 = vector.shape_cast %52 : vector<128xf32> to vector<1x128xf32>
      %cst_33 = arith.constant 1.600000e+01 : f32
      %54 = vector.broadcast %cst_33 : f32 to vector<1x128xf32>
      %55 = arith.divf %53, %54 : vector<1x128xf32>
      %56 = arith.mulf %51, %51 : vector<16x128xf32>
      %cst_34 = arith.constant dense<0.000000e+00> : vector<128xf32>
      %57 = vector.multi_reduction <add>, %56, %cst_34 [0] : vector<16x128xf32> to vector<128xf32>
      %58 = vector.shape_cast %57 : vector<128xf32> to vector<1x128xf32>
      %cst_35 = arith.constant 1.600000e+01 : f32
      %59 = vector.broadcast %cst_35 : f32 to vector<1x128xf32>
      %60 = arith.divf %58, %59 : vector<1x128xf32>
      %61 = arith.mulf %55, %55 : vector<1x128xf32>
      %62 = arith.subf %60, %61 : vector<1x128xf32>
      %63 = vector.broadcast %55 : vector<1x128xf32> to vector<16x128xf32>
      %64 = arith.subf %51, %63 : vector<16x128xf32>
      %cst_36 = arith.constant 9.99999974E-6 : f32
      %65 = vector.broadcast %cst_36 : f32 to vector<1x128xf32>
      %66 = arith.addf %62, %65 : vector<1x128xf32>
      %67 = math.rsqrt %66 : vector<1x128xf32>
      %68 = vector.broadcast %67 : vector<1x128xf32> to vector<16x128xf32>
      %69 = arith.mulf %64, %68 : vector<16x128xf32>
      %c0_37 = arith.constant 0 : index
      %c0_38 = arith.constant 0 : index
      %70 = vector.load %arg12[%c0_37, %c0_38] : memref<1x128xf32, #tpu.memory_space<vmem>>, vector<1x128xf32>
      %71 = vector.broadcast %70 : vector<1x128xf32> to vector<16x128xf32>
      %72 = arith.mulf %69, %71 : vector<16x128xf32>
      %c0_39 = arith.constant 0 : index
      %c0_40 = arith.constant 0 : index
      %73 = vector.load %arg13[%c0_39, %c0_40] : memref<1x128xf32, #tpu.memory_space<vmem>>, vector<1x128xf32>
      %74 = vector.broadcast %73 : vector<1x128xf32> to vector<16x128xf32>
      %75 = arith.addf %72, %74 : vector<16x128xf32>
      %76 = arith.negf %75 : vector<16x128xf32>
      %77 = math.exp %76 : vector<16x128xf32>
      %cst_41 = arith.constant 1.000000e+00 : f32
      %78 = vector.broadcast %cst_41 : f32 to vector<16x128xf32>
      %79 = arith.addf %78, %77 : vector<16x128xf32>
      %80 = arith.divf %78, %79 : vector<16x128xf32>
      %81 = arith.mulf %75, %80 : vector<16x128xf32>
      %82 = arith.addf %44, %81 : vector<16x128xf32>
      %c0_42 = arith.constant 0 : index
      %c0_43 = arith.constant 0 : index
      %83 = vector.load %arg15[%c0_42, %c0_43] : memref<16x128xf32, #tpu.memory_space<vmem>>, vector<16x128xf32>
      tpu.vector_store %arg15[%c0_42, %c0_43], %82 {strides = array<i32>} : memref<16x128xf32, #tpu.memory_space<vmem>>, vector<16x128xf32>,
    } else {
    }
    return
  }
  func.func @transform_0(%arg0: i32, %arg1: i32) -> (i32, i32) {
    %c0_i32 = arith.constant 0 : i32
    %c0_i32_0 = arith.constant 0 : i32
    return %arg1, %c0_i32 : i32, i32
  }
  func.func @transform_1(%arg0: i32, %arg1: i32) -> (i32, i32) {
    %c0_i32 = arith.constant 0 : i32
    %c0_i32_0 = arith.constant 0 : i32
    %c0_i32_1 = arith.constant 0 : i32
    return %c0_i32, %c0_i32_0 : i32, i32
  }
  func.func @transform_2(%arg0: i32, %arg1: i32) -> (i32, i32) {
    %c0_i32 = arith.constant 0 : i32
    %c0_i32_0 = arith.constant 0 : i32
    %c0_i32_1 = arith.constant 0 : i32
    return %c0_i32, %c0_i32_0 : i32, i32
  }
  func.func @transform_3(%arg0: i32, %arg1: i32) -> (i32, i32) {
    %c0_i32 = arith.constant 0 : i32
    %c0_i32_0 = arith.constant 0 : i32
    return %arg1, %c0_i32 : i32, i32
  }
  func.func @transform_4(%arg0: i32, %arg1: i32) -> (i32, i32) {
    %c0_i32 = arith.constant 0 : i32
    %c0_i32_0 = arith.constant 0 : i32
    return %arg1, %c0_i32 : i32, i32
  }
  func.func @transform_5(%arg0: i32, %arg1: i32) -> (i32, i32) {
    %c0_i32 = arith.constant 0 : i32
    %c0_i32_0 = arith.constant 0 : i32
    %c0_i32_1 = arith.constant 0 : i32
    return %c0_i32, %c0_i32_0 : i32, i32
  }
  func.func @transform_6(%arg0: i32, %arg1: i32) -> (i32, i32) {
    %c0_i32 = arith.constant 0 : i32
    %c0_i32_0 = arith.constant 0 : i32
    %c0_i32_1 = arith.constant 0 : i32
    return %c0_i32, %c0_i32_0 : i32, i32
  }
  func.func @transform_7(%arg0: i32, %arg1: i32) -> (i32, i32) {
    %c0_i32 = arith.constant 0 : i32
    %c0_i32_0 = arith.constant 0 : i32
    %c0_i32_1 = arith.constant 0 : i32
    return %c0_i32, %c0_i32_0 : i32, i32
  }
  func.func @transform_8(%arg0: i32, %arg1: i32) -> (i32, i32) {
    %c0_i32 = arith.constant 0 : i32
    %c0_i32_0 = arith.constant 0 : i32
    %c0_i32_1 = arith.constant 0 : i32
    return %c0_i32, %c0_i32_0 : i32, i32
  }
  func.func @transform_9(%arg0: i32, %arg1: i32) -> (i32, i32) {
    %c0_i32 = arith.constant 0 : i32
    %c0_i32_0 = arith.constant 0 : i32
    %c0_i32_1 = arith.constant 0 : i32
    return %c0_i32, %c0_i32_0 : i32, i32
  }
  func.func @transform_10(%arg0: i32, %arg1: i32) -> (i32, i32) {
    %c0_i32 = arith.constant 0 : i32
    %c0_i32_0 = arith.constant 0 : i32
    %c0_i32_1 = arith.constant 0 : i32
    return %c0_i32, %c0_i32_0 : i32, i32
  }
  func.func @transform_11(%arg0: i32, %arg1: i32) -> (i32, i32) {
    %c0_i32 = arith.constant 0 : i32
    %c0_i32_0 = arith.constant 0 : i32
    %c0_i32_1 = arith.constant 0 : i32
    return %c0_i32, %c0_i32_0 : i32, i32
  }
  func.func @transform_12(%arg0: i32, %arg1: i32) -> (i32, i32) {
    %c0_i32 = arith.constant 0 : i32
    %c0_i32_0 = arith.constant 0 : i32
    return %arg1, %c0_i32 : i32, i32
  }
  func.func @transform_13(%arg0: i32, %arg1: i32) -> (i32, i32) {
    %c0_i32 = arith.constant 0 : i32
    %c0_i32_0 = arith.constant 0 : i32
    %c0_i32_1 = arith.constant 0 : i32
    return %c0_i32, %c0_i32_0 : i32, i32
  }
}

</mosaic_0001>

<bundles_post_ra>
// kernel: edge_gated_graph_conv.2
= control target key start
LH: loop header
LB: loop body
LE: loop exit
PB: predicated region body
PF: predicated region fallthrough
CT: control target
= control target key end

     0   :  { %s969_s30 = smov 0   ;;  %s1194_s0 = inlined_call_operand.vmem [shape: f32[16,128], index: 0, kind: input, shape index: {}]   ;;  %s1195_s1 = inlined_call_operand.vmem [shape: f32[64,128], index: 1, kind: input, shape index: {}]   ;;  %s1196_s2 = inlined_call_operand.vmem [shape: s32[64,1], index: 2, kind: input, shape index: {}]   ;;  %s1197_s3 = inlined_call_operand.vmem [shape: s32[64,1], index: 3, kind: input, shape index: {}]   ;;  %s1198_s4 = inlined_call_operand.vmem [shape: f32[128,256], index: 4, kind: input, shape index: {}]   ;;  %s1199_s5 = inlined_call_operand.vmem [shape: f32[128,128], index: 5, kind: input, shape index: {}]   ;;  %s1200_s6 = inlined_call_operand.vmem [shape: f32[1,128], index: 6, kind: input, shape index: {}]   ;;  %s1201_s7 = inlined_call_operand.vmem [shape: bf16[64,128], index: 7, kind: output, shape index: {0}]   ;;  %s1202_s8 = inlined_call_operand.vmem [shape: f32[1,128], index: 8, kind: output, shape index: {1}]   ;;  %s1203_s9 = inlined_call_operand.vmem [shape: f32[1,128], index: 9, kind: output, shape index: {2}]  }
   0x1 LB: > { %s975_s10 = sadd.s32 4294967295, %s914_s30   ;;  %p807_p0 = scmp.ge.s32.totalorder %s914_s30, 1  ;;  %s914_s30 = sphi %s969_s30, %s20_s30  }
   0x2   : > { %p305_p1 = scmp.lt.s32.totalorder %s914_s30, 3 }
   0x4   : > { %p306_p2 = pnand %p807_p0, %p305_p1 }
   0x5   : > { %s808_s11 = sshll.u32 (!%p306_p2), %s975_s10, 2  ;;  %p816_p4 = scmp.ne.s32.totalorder (!%p306_p2), %s975_s10, 0 }
   0x6   : > { %309 = sbr.rel (%p306_p2) target bundleno = 490 (0x1ea), region = 48  ;;  %p352_p3 = scmp.lt.s32.totalorder (!%p306_p2), %s808_s11, 7 }
   0xb   : > { %s1205_s11 = smov (!%p352_p3, %s808_s11), 7  ;;  %379 = sbr.rel (%p816_p4) target bundleno = 183 (0xb7), region = 52 }
   0xc   : > { %s809_s12 = sshll.u32 %s1205_s11, 3  ;;  %s815_s13 = sshll.u32 %s1205_s11, 2 }
   0xd   : > { %s983_s16 = scalar_lea.vmem %s1195_s1, %s809_s12  ;;  %s988_s19 = scalar_lea.vmem %s1196_s2, %s809_s12 }
   0xe   : > { %s993_s22 = scalar_lea.vmem %s1197_s3, %s809_s12  ;;  %s998_s25 = scalar_lea.vmem %s1201_s7, %s815_s13 }
  0x10   : > { %v412_v0 = vld [vmem:[%s1198_s4 + $0xf0] sm:$0xff]  ;;  %v413_v1 = vld [vmem:[%s1198_s4 + $0xf8] sm:$0xff]  ;;  %v410_v2 = vld [vmem:[%s1198_s4 + $0xe0] sm:$0xff]  ;;  %v916_v34 = vmov 0.0  }
  0x11   : > { %845 = vmatpush.msra.mxu2 %v412_v0  ;;  %861 = vmatpush.msra.mxu3 %v413_v1  ;;  %v411_v3 = vld [vmem:[%s1198_s4 + $0xe8] sm:$0xff]  ;;  %v408_v4 = vld [vmem:[%s1198_s4 + $0xd0] sm:$0xff]  ;;  %v409_v5 = vld [vmem:[%s1198_s4 + $0xd8] sm:$0xff]  ;;  %464 = vst [vmem:[%s1202_s8] sm:$0x1] %v916_v34 }
  0x12   : > { %414 = vmatpush.msra.mxu0 %v412_v0  ;;  %437 = vmatpush.msra.mxu1 %v413_v1  ;;  %v406_v6 = vld [vmem:[%s1198_s4 + $0xc0] sm:$0xff]  ;;  %v407_v7 = vld [vmem:[%s1198_s4 + $0xc8] sm:$0xff]  ;;  %v404_v8 = vld [vmem:[%s1198_s4 + $0xb0] sm:$0xff]  ;;  %465 = vst [vmem:[%s1203_s9] sm:$0x1] %v916_v34 }
  0x13   : > { %846 = vmatpush.msra.mxu2 %v410_v2  ;;  %862 = vmatpush.msra.mxu3 %v411_v3  ;;  %v405_v9 = vld [vmem:[%s1198_s4 + $0xb8] sm:$0xff]  ;;  %v402_v10 = vld [vmem:[%s1198_s4 + $0xa0] sm:$0xff]  ;;  %v403_v11 = vld [vmem:[%s1198_s4 + $0xa8] sm:$0xff] }
  0x14   : > { %415 = vmatpush.msra.mxu0 %v410_v2  ;;  %438 = vmatpush.msra.mxu1 %v411_v3  ;;  %v400_v12 = vld [vmem:[%s1198_s4 + $0x90] sm:$0xff]  ;;  %v401_v13 = vld [vmem:[%s1198_s4 + $0x98] sm:$0xff]  ;;  %v398_v14 = vld [vmem:[%s1198_s4 + $0x80] sm:$0xff] }
  0x15   : > { %847 = vmatpush.msra.mxu2 %v408_v4  ;;  %863 = vmatpush.msra.mxu3 %v409_v5  ;;  %v399_v15 = vld [vmem:[%s1198_s4 + $0x88] sm:$0xff]  ;;  %v396_v16 = vld [vmem:[%s1198_s4 + $0x70] sm:$0xff]  ;;  %v397_v17 = vld [vmem:[%s1198_s4 + $0x78] sm:$0xff] }
  0x16   : > { %416 = vmatpush.msra.mxu0 %v408_v4  ;;  %439 = vmatpush.msra.mxu1 %v409_v5  ;;  %v394_v18 = vld [vmem:[%s1198_s4 + $0x60] sm:$0xff]  ;;  %v395_v19 = vld [vmem:[%s1198_s4 + $0x68] sm:$0xff]  ;;  %v392_v20 = vld [vmem:[%s1198_s4 + $0x50] sm:$0xff] }
  0x17   : > { %848 = vmatpush.msra.mxu2 %v406_v6  ;;  %864 = vmatpush.msra.mxu3 %v407_v7  ;;  %v393_v21 = vld [vmem:[%s1198_s4 + $0x58] sm:$0xff]  ;;  %v390_v22 = vld [vmem:[%s1198_s4 + $0x40] sm:$0xff]  ;;  %v391_v23 = vld [vmem:[%s1198_s4 + $0x48] sm:$0xff] }
  0x18   : > { %417 = vmatpush.msra.mxu0 %v406_v6  ;;  %440 = vmatpush.msra.mxu1 %v407_v7  ;;  %v388_v24 = vld [vmem:[%s1198_s4 + $0x30] sm:$0xff]  ;;  %v389_v25 = vld [vmem:[%s1198_s4 + $0x38] sm:$0xff]  ;;  %v386_v26 = vld [vmem:[%s1198_s4 + $0x20] sm:$0xff] }
  0x19   : > { %849 = vmatpush.msra.mxu2 %v404_v8  ;;  %865 = vmatpush.msra.mxu3 %v405_v9  ;;  %v387_v27 = vld [vmem:[%s1198_s4 + $0x28] sm:$0xff]  ;;  %v384_v28 = vld [vmem:[%s1198_s4 + $0x10] sm:$0xff]  ;;  %v385_v29 = vld [vmem:[%s1198_s4 + $0x18] sm:$0xff] }
  0x1a   : > { %418 = vmatpush.msra.mxu0 %v404_v8  ;;  %441 = vmatpush.msra.mxu1 %v405_v9  ;;  %v382_v30 = vld [vmem:[%s1198_s4] sm:$0xff]  ;;  %v383_v31 = vld [vmem:[%s1198_s4 + $0x8] sm:$0xff] }
  0x1b   : > { %850 = vmatpush.msra.mxu2 %v402_v10  ;;  %866 = vmatpush.msra.mxu3 %v403_v11  ;;  %v381_v32 = vld [vmem:[%s1194_s0 + $0x8] sm:$0xff]  ;;  %v380_v33 = vld [vmem:[%s1194_s0] sm:$0xff] }
  0x1c   : > { %419 = vmatpush.msra.mxu0 %v402_v10  ;;  %442 = vmatpush.msra.mxu1 %v403_v11 }
  0x1d   : > { %851 = vmatpush.msra.mxu2 %v400_v12  ;;  %867 = vmatpush.msra.mxu3 %v401_v13 }
  0x1e   : > { %420 = vmatpush.msra.mxu0 %v400_v12  ;;  %443 = vmatpush.msra.mxu1 %v401_v13 }
  0x1f   : > { %852 = vmatpush.msra.mxu2 %v398_v14  ;;  %868 = vmatpush.msra.mxu3 %v399_v15 }
  0x20   : > { %421 = vmatpush.msra.mxu0 %v398_v14  ;;  %444 = vmatpush.msra.mxu1 %v399_v15 }
  0x21   : > { %853 = vmatpush.msra.mxu2 %v396_v16  ;;  %869 = vmatpush.msra.mxu3 %v397_v17 }
  0x22   : > { %422 = vmatpush.msra.mxu0 %v396_v16  ;;  %445 = vmatpush.msra.mxu1 %v397_v17 }
  0x23   : > { %854 = vmatpush.msra.mxu2 %v394_v18  ;;  %870 = vmatpush.msra.mxu3 %v395_v19 }
  0x24   : > { %423 = vmatpush.msra.mxu0 %v394_v18  ;;  %446 = vmatpush.msra.mxu1 %v395_v19 }
  0x25   : > { %855 = vmatpush.msra.mxu2 %v392_v20  ;;  %871 = vmatpush.msra.mxu3 %v393_v21 }
  0x26   : > { %424 = vmatpush.msra.mxu0 %v392_v20  ;;  %447 = vmatpush.msra.mxu1 %v393_v21 }
  0x27   : > { %856 = vmatpush.msra.mxu2 %v390_v22  ;;  %872 = vmatpush.msra.mxu3 %v391_v23 }
  0x28   : > { %425 = vmatpush.msra.mxu0 %v390_v22  ;;  %448 = vmatpush.msra.mxu1 %v391_v23 }
  0x29   : > { %857 = vmatpush.msra.mxu2 %v388_v24  ;;  %873 = vmatpush.msra.mxu3 %v389_v25 }
  0x2a   : > { %426 = vmatpush.msra.mxu0 %v388_v24  ;;  %449 = vmatpush.msra.mxu1 %v389_v25 }
  0x2b   : > { %858 = vmatpush.msra.mxu2 %v386_v26  ;;  %874 = vmatpush.msra.mxu3 %v387_v27 }
  0x2c   : > { %427 = vmatpush.msra.mxu0 %v386_v26  ;;  %450 = vmatpush.msra.mxu1 %v387_v27 }
  0x2d   : > { %859 = vmatpush.msra.mxu2 %v384_v28  ;;  %875 = vmatpush.msra.mxu3 %v385_v29 }
  0x2e   : > { %428 = vmatpush.msra.mxu0 %v384_v28  ;;  %451 = vmatpush.msra.mxu1 %v385_v29 }
  0x2f   : > { %860 = vmatpush.msra.mxu2 %v382_v30  ;;  %876 = vmatpush.msra.mxu3 %v383_v31 }
  0x30   : > { %433 = vmatmul.f32.vlgmr.msra.gmra.mxu2 %v381_v32  ;;  %456 = vmatmul.f32.vlgmr.msra.gmra.mxu3 %v381_v32 }
  0x31   : > { %429 = vmatpush.msra.mxu0 %v382_v30  ;;  %452 = vmatpush.msra.mxu1 %v383_v31 }
  0x32   : > { %430 = vmatmul.f32.vlgmr.msra.gmra.mxu0 %v380_v33  ;;  %453 = vmatmul.f32.vlgmr.msra.gmra.mxu1 %v380_v33 }
  0xaf   : > { %v431_v35 = vpop.f32.mrf.mxu0  ;;  %v454_v36 = vpop.f32.mrf.mxu1 }
  0xb0   : > { %v460_v37 = vpack.c.bf16 %v454_v36, %v431_v35 }
  0xb2   : > { %462 = vst [vmem:[#allocation2] sm:$0xff] %v460_v37 }
  0xb3   : > { %v434_v38 = vpop.f32.mrf.mxu2  ;;  %v457_v39 = vpop.f32.mrf.mxu3 }
  0xb4   : > { %v461_v40 = vpack.c.bf16 %v457_v39, %v434_v38 }
  0xb6   : > { %463 = vst [vmem:[#allocation2 + $0x8] sm:$0xff] %v461_v40 }
  0xb7 PF: > { %v470_v41 = vld [vmem:[%s993_s22] sm:$0xff]  ;;  %v917_v43 = vmov 0   ;;  %v472_v44 = vld [vmem:[%s993_s22 + $0x10] sm:$0xff]  ;;  %v493_v45 = vld [vmem:[%s1199_s5 + $0x78] sm:$0xff]  ;;  %v527_v12 = vlaneseq  ;;  %vm581_vm4 = vcmask 130048   ;;  %v918_v19 = vmov 0.0  }
  0xb8   : > { %v466_v42 = vld [vmem:[%s988_s19] sm:$0xff]  ;;  %905 = vset.pattern.permute.xlu1 %v917_v43  ;;  %904 = vset.pattern.permute.xlu0 %v917_v43  ;;  %v492_v46 = vld [vmem:[%s1199_s5 + $0x70] sm:$0xff]  ;;  %v491_v47 = vld [vmem:[%s1199_s5 + $0x68] sm:$0xff] }
  0xb9   : > { %552 = vperm.xlu0 %904, %v470_v41   ;;  %530 = vperm.xlu1 %905, %v466_v42   ;;  %v490_v48 = vld [vmem:[%s1199_s5 + $0x60] sm:$0xff]  ;;  %v471_v49 = vld [vmem:[%s993_s22 + $0x8] sm:$0xff]  ;;  %v489_v51 = vld [vmem:[%s1199_s5 + $0x58] sm:$0xff]  ;;  %v528_v15 = vand.u32 127, %v527_v12 }
  0xba   : > { %906 = vset.pattern.permute.xlu2 %v917_v43  ;;  %498 = vmatpush.msra.mxu0 %v493_v45  ;;  %v467_v50 = vld [vmem:[%s988_s19 + $0x8] sm:$0xff]  ;;  %v473_v52 = vld [vmem:[%s993_s22 + $0x18] sm:$0xff]  ;;  %v488_v53 = vld [vmem:[%s1199_s5 + $0x50] sm:$0xff]  ;;  %v658_v43 = vshrl.u32 %v527_v12, 7  ;;  %s829_s22 = sshll.u32 %s975_s10, 5 }
  0xbb   : > { %558 = vperm.xlu2 %906, %v472_v44   ;;  %877 = vmatpush.msra.mxu3 %v493_v45  ;;  %v487_v54 = vld [vmem:[%s1199_s5 + $0x48] sm:$0xff]  ;;  %v486_v55 = vld [vmem:[%s1199_s5 + $0x40] sm:$0xff]  ;;  %v468_v56 = vld [vmem:[%s988_s19 + $0x10] sm:$0xff] }
  0xbc   : > { %499 = vmatpush.msra.mxu0 %v492_v46  ;;  %v469_v57 = vld [vmem:[%s988_s19 + $0x18] sm:$0xff]  ;;  %v484_v59 = vld [vmem:[%s1199_s5 + $0x30] sm:$0xff]  ;;  %v483_v60 = vld [vmem:[%s1199_s5 + $0x28] sm:$0xff] }
  0xbd   : > { %878 = vmatpush.msra.mxu3 %v492_v46  ;;  %v485_v58 = vld [vmem:[%s1199_s5 + $0x38] sm:$0xff]  ;;  %v482_v61 = vld [vmem:[%s1199_s5 + $0x20] sm:$0xff]  ;;  %v480_v63 = vld [vmem:[%s1199_s5 + $0x10] sm:$0xff] }
  0xbe   : > { %500 = vmatpush.msra.mxu0 %v491_v47  ;;  %v481_v62 = vld [vmem:[%s1199_s5 + $0x18] sm:$0xff]  ;;  %v479_v0 = vld [vmem:[%s1199_s5 + $0x8] sm:$0xff]  ;;  %v819_v1 = vld [vmem:[#allocation2] sm:$0xf] }
  0xbf   : > { %879 = vmatpush.msra.mxu3 %v491_v47  ;;  %v832_v2 = vld [vmem:[#allocation2 + $0x4] sm:$0xf0]  ;;  %v825_v3 = vld [vmem:[#allocation2 + $0x4] sm:$0xf]  ;;  %v833_v5 = vld [vmem:[#allocation2 + $0x8] sm:$0xf0] }
  0xc0   : > { %501 = vmatpush.msra.mxu0 %v490_v48  ;;  %v820_v4 = vor.u32 %v832_v2, %v819_v1  ;;  %v478_v6 = vld [vmem:[%s1199_s5] sm:$0xff]  ;;  %v826_v7 = vor.u32 %v833_v5, %v825_v3  ;;  %v475_v9 = vld [vmem:[%s983_s16 + $0x8] sm:$0xff]  ;;  %v476_v10 = vld [vmem:[%s983_s16 + $0x10] sm:$0xff] }
  0xc1   : > { %555 = vperm.xlu0 %904, %v471_v49   ;;  %533 = vperm.xlu1 %905, %v467_v50   ;;  %v474_v8 = vld [vmem:[%s983_s16] sm:$0xff]  ;;  %v477_v11 = vld [vmem:[%s983_s16 + $0x18] sm:$0xff] }
  0xc2   : > { %502 = vmatpush.msra.mxu0 %v489_v51  ;;  %880 = vmatpush.msra.mxu3 %v490_v48  ;;  %v907_v37 = vld [vmem:[%s1200_s6] ss:$0 sm:$0xff]  ;;  %v659_v48 = vadd.s32 8, %v658_v43 }
  0xc3   : > { %561 = vperm.xlu2 %906, %v473_v52   ;;  %595 = vmatpush.bf16.msra.mxu1 %v820_v4  ;;  %v660_v52 = vadd.s32 16, %v658_v43 }
  0xc4   : > { %503 = vmatpush.msra.mxu0 %v488_v53  ;;  %881 = vmatpush.msra.mxu3 %v489_v51 }
  0xc5   : > { %632 = vmatpush.bf16.msra.mxu2 %v826_v7 }
  0xc6   : > { %504 = vmatpush.msra.mxu0 %v487_v54  ;;  %882 = vmatpush.msra.mxu3 %v488_v53  ;;  %v662_v53 = vstv %s829_s22 }
  0xc8   : > { %505 = vmatpush.msra.mxu0 %v486_v55  ;;  %883 = vmatpush.msra.mxu3 %v487_v54 }
  0xc9   : > { %536 = vperm.xlu0 %904, %v468_v56   ;;  %539 = vperm.xlu1 %905, %v469_v57   ;;  %v664_v56 = vadd.s32 %v662_v53, %v659_v48  ;;  %v663_v57 = vadd.s32 %v662_v53, %v658_v43 }
  0xca   : > { %506 = vmatpush.msra.mxu0 %v485_v58  ;;  %884 = vmatpush.msra.mxu3 %v486_v55 }
  0xcb   : > { %vm668_vm9 = vcmp.lt.s32.totalorder %v664_v56, 60  ;;  %vm667_vm10 = vcmp.lt.s32.totalorder %v663_v57, 60 }
  0xcc   : > { %507 = vmatpush.msra.mxu0 %v484_v59  ;;  %885 = vmatpush.msra.mxu3 %v485_v58  ;;  %v665_v58 = vadd.s32 %v662_v53, %v660_v52 }
  0xce   : > { %508 = vmatpush.msra.mxu0 %v483_v60  ;;  %886 = vmatpush.msra.mxu3 %v484_v59  ;;  %vm669_vm11 = vcmp.lt.s32.totalorder %v665_v58, 60 }
  0xd0   : > { %887 = vmatpush.msra.mxu3 %v483_v60  ;;  %509 = vmatpush.msra.mxu0 %v482_v61 }
  0xd2   : > { %888 = vmatpush.msra.mxu3 %v482_v61  ;;  %510 = vmatpush.msra.mxu0 %v481_v62 }
  0xd4   : > { %889 = vmatpush.msra.mxu3 %v481_v62  ;;  %511 = vmatpush.msra.mxu0 %v480_v63  ;;  %v661_v62 = vadd.s32 24, %v658_v43 }
  0xd6   : > { %890 = vmatpush.msra.mxu3 %v480_v63  ;;  %512 = vmatpush.msra.mxu0 %v479_v0  ;;  %v666_v3 = vadd.s32 %v662_v53, %v661_v62 }
  0xd8   : > { %891 = vmatpush.msra.mxu3 %v479_v0  ;;  %513 = vmatpush.msra.mxu0 %v478_v6  ;;  %vm670_vm12 = vcmp.lt.s32.totalorder %v666_v3, 60 }
  0xd9   : > { %514 = vmatmul.f32.vlgmr.msra.gmra.mxu0 %v474_v8 }
  0xda   : > { %892 = vmatpush.msra.mxu3 %v478_v6 }
  0xdb   : > { %520 = vmatmul.f32.vlgmr.msra.gmra.mxu3 %v476_v10 }
  0xe1   : > { %517 = vmatmul.f32.gmra.mxu0 %v475_v9 }
  0xe3   : > { %523 = vmatmul.f32.gmra.mxu3 %v477_v11 }
 0x115   : > { %v559_v16 = vpop.permute.xlu2 %558 }
 0x116   : > { %vm565_vm5 = vcmp.eq.s32.totalorder %v559_v16, %v528_v15 }
 0x117   : > { %v569_v29 = vsel %vm565_vm5, 1.0, %v918_v19 }
 0x11d   : > { %v562_v26 = vpop.permute.xlu2 %561 }
 0x11e   : > { %vm566_vm6 = vcmp.eq.s32.totalorder %v562_v26, %v528_v15 }
 0x11f   : > { %v570_v30 = vsel %vm566_vm6, 1.0, %v918_v19 }
 0x120   : > { %v572_v33 = vpack.c.bf16 %v570_v30, %v569_v29  ;;  %v683_v30 = vld [vmem:[%s1202_s8] sm:$0x1] }
 0x12b   : > { %v553_v13 = vpop.permute.xlu0 %552  ;;  %v531_v14 = vpop.permute.xlu1 %530 }
 0x12c   : > { %vm563_vm0 = vcmp.eq.s32.totalorder %v553_v13, %v528_v15  ;;  %vm541_vm1 = vcmp.eq.s32.totalorder %v531_v14, %v528_v15 }
 0x12d   : > { %v567_v20 = vsel %vm563_vm0, 1.0, %v918_v19  ;;  %v545_v21 = vsel %vm541_vm1, 1.0, %v918_v19 }
 0x133   : > { %v556_v17 = vpop.permute.xlu0 %555  ;;  %v534_v18 = vpop.permute.xlu1 %533 }
 0x134   : > { %vm564_vm2 = vcmp.eq.s32.totalorder %v556_v17, %v528_v15  ;;  %vm542_vm3 = vcmp.eq.s32.totalorder %v534_v18, %v528_v15 }
 0x135   : > { %v568_v22 = vsel %vm564_vm2, 1.0, %v918_v19  ;;  %v546_v23 = vsel %vm542_vm3, 1.0, %v918_v19 }
 0x136   : > { %v571_v24 = vpack.c.bf16 %v568_v22, %v567_v20  ;;  %v549_v25 = vpack.c.bf16 %v546_v23, %v545_v21 }
 0x138   : > { %821 = vmatmul.msk.bf16.vlgmr.msra.gmra.mxu1 %vm581_vm4, %v549_v25  ;;  %827 = vmatmul.msk.bf16.vlgmr.msra.gmra.mxu2 %vm581_vm4, %v571_v24 }
 0x13b   : > { %v537_v27 = vpop.permute.xlu0 %536  ;;  %v540_v28 = vpop.permute.xlu1 %539 }
 0x13c   : > { %vm543_vm7 = vcmp.eq.s32.totalorder %v537_v27, %v528_v15  ;;  %vm544_vm8 = vcmp.eq.s32.totalorder %v540_v28, %v528_v15 }
 0x13d   : > { %v547_v31 = vsel %vm543_vm7, 1.0, %v918_v19  ;;  %v548_v32 = vsel %vm544_vm8, 1.0, %v918_v19 }
 0x13e   : > { %v550_v34 = vpack.c.bf16 %v548_v32, %v547_v31 }
 0x148   : > { %822 = vmatmul.msk.bf16.gmra.mxu1 %vm581_vm4, %v550_v34  ;;  %828 = vmatmul.msk.bf16.gmra.mxu2 %vm581_vm4, %v572_v33  ;;  %v695_v33 = vld [vmem:[%s1203_s9] sm:$0x1] }
 0x156   : > { %v515_v35 = vpop.f32.mrf.mxu0 }
 0x157   : > { %v516_v41 = vadd.f32 %v907_v37, %v515_v35 }
 0x15e   : > { %v518_v38 = vpop.f32.mrf.mxu0  ;;  %v521_v44 = vpop.f32.mrf.mxu3 }
 0x15f   : > { %v519_v42 = vadd.f32 %v907_v37, %v518_v38  ;;  %v522_v54 = vadd.f32 %v907_v37, %v521_v44 }
 0x166   : > { %v524_v60 = vpop.f32.mrf.mxu3 }
 0x167   : > { %v525_v1 = vadd.f32 %v907_v37, %v524_v60 }
 0x1b5   : > { %v597_v36 = vpop.f32.mrf.mxu1 }
 0x1b6   : > { %v607_v45 = vadd.f32 %v597_v36, %v516_v41 }
 0x1bb   : > { %v634_v39 = vpop.f32.mrf.mxu2 }
 0x1bc   : > { %v644_v49 = vadd.f32 %v634_v39, %v607_v45 }
 0x1bd   : > { %v599_v40 = vpop.f32.mrf.mxu1 }
 0x1be   : > { %v608_v46 = vadd.f32 %v599_v40, %v519_v42  ;;  %v679_v4 = vsel %vm667_vm10, %v644_v49, 0.0 }
 0x1bf   : > { %v696_v8 = vmul.f32 %v679_v4, %v644_v49 }
 0x1c3   : > { %v636_v47 = vpop.f32.mrf.mxu2 }
 0x1c4   : > { %v645_v50 = vadd.f32 %v636_v47, %v608_v46 }
 0x1c5   : > { %v602_v51 = vpop.f32.mrf.mxu1 }
 0x1c6   : > { %v837_v55 = vpack.c.bf16 %v645_v50, %v644_v49  ;;  %v609_v59 = vadd.f32 %v602_v51, %v522_v54  ;;  %v680_v0 = vsel %vm668_vm9, %v645_v50, 0.0 }
 0x1c7   : > { %v697_v6 = vmul.f32 %v680_v0, %v645_v50  ;;  %v684_v9 = vadd.f32 %v680_v0, %v679_v4 }
 0x1c8   : > { %838 = vst [vmem:[%s998_s25] sm:$0xff] %v837_v55  }
 0x1c9   : > { %v700_v13 = vadd.f32 %v697_v6, %v696_v8 }
 0x1cb   : > { %v639_v61 = vpop.f32.mrf.mxu2 }
 0x1cc   : > { %v646_v63 = vadd.f32 %v639_v61, %v609_v59 }
 0x1cd   : > { %v604_v2 = vpop.f32.mrf.mxu1 }
 0x1ce   : > { %v681_v5 = vsel %vm669_vm11, %v646_v63, 0.0  ;;  %v610_v7 = vadd.f32 %v604_v2, %v525_v1 }
 0x1cf   : > { %v698_v10 = vmul.f32 %v681_v5, %v646_v63  ;;  %v685_v14 = vadd.f32 %v684_v9, %v681_v5 }
 0x1d1   : > { %v701_v17 = vadd.f32 %v700_v13, %v698_v10 }
 0x1d3   : > { %v641_v11 = vpop.f32.mrf.mxu2 }
 0x1d4   : > { %v647_v12 = vadd.f32 %v641_v11, %v610_v7 }
 0x1d6   : > { %v842_v15 = vpack.c.bf16 %v647_v12, %v646_v63  ;;  %v682_v16 = vsel %vm670_vm12, %v647_v12, 0.0 }
 0x1d7   : > { %v686_v18 = vadd.f32 %v685_v14, %v682_v16  ;;  %v699_v19 = vmul.f32 %v682_v16, %v647_v12 }
 0x1d8   : > { %844 = vst [vmem:[%s998_s25 + $0x8] sm:$0xff] %v842_v15  }
 0x1d9   : > { %v687_v20 = vrot.slane %v686_v18, 4  ;;  %v702_v21 = vadd.f32 %v701_v17, %v699_v19 }
 0x1db   : > { %v688_v22 = vadd.f32 %v687_v20, %v686_v18  ;;  %v703_v23 = vrot.slane %v702_v21, 4 }
 0x1dd   : > { %v689_v24 = vrot.slane %v688_v22, 2  ;;  %v704_v25 = vadd.f32 %v703_v23, %v702_v21 }
 0x1df   : > { %v690_v26 = vadd.f32 %v689_v24, %v688_v22  ;;  %v705_v27 = vrot.slane %v704_v25, 2 }
 0x1e1   : > { %v691_v28 = vrot.slane %v690_v26, 1  ;;  %v706_v29 = vadd.f32 %v705_v27, %v704_v25 }
 0x1e3   : > { %v692_v31 = vadd.f32 %v691_v28, %v690_v26  ;;  %v707_v32 = vrot.slane %v706_v29, 1 }
 0x1e5   : > { %v693_v34 = vadd.f32 %v692_v31, %v683_v30  ;;  %v708_v35 = vadd.f32 %v707_v32, %v706_v29 }
 0x1e7   : > { %694 = vst [vmem:[%s1202_s8] sm:$0x1] %v693_v34  ;;  %v709_v36 = vadd.f32 %v708_v35, %v695_v33 }
 0x1e9   : > { %710 = vst [vmem:[%s1203_s9] sm:$0x1] %v709_v36 }
 0x1ea PF: > { %s20_s30 = sadd.s32 1, %s914_s30  }
 0x1eb   : > { %p17_p5 = scmp.ge.s32.totalorder %s20_s30, 4  }
 0x1ed   :  { %19 = sbr.rel (!%p17_p5) target bundleno = 1 (0x1), region = 104 }

// kernel: edge_gated_graph_conv.3
= control target key start
LH: loop header
LB: loop body
LE: loop exit
PB: predicated region body
PF: predicated region fallthrough
CT: control target
= control target key end

     0   :  { %s2006_s0 = inlined_call_operand.vmem [shape: bf16[64,128], index: 0, kind: input, shape index: {}]   ;;  %s2007_s1 = inlined_call_operand.vmem [shape: f32[1,128], index: 1, kind: input, shape index: {}]   ;;  %s2008_s2 = inlined_call_operand.vmem [shape: f32[1,128], index: 2, kind: input, shape index: {}]   ;;  %s2009_s3 = inlined_call_operand.vmem [shape: s32[64,1], index: 3, kind: input, shape index: {}]   ;;  %s2010_s4 = inlined_call_operand.vmem [shape: s32[64,1], index: 4, kind: input, shape index: {}]   ;;  %s2011_s5 = inlined_call_operand.vmem [shape: f32[16,128], index: 5, kind: input, shape index: {}]   ;;  %s2012_s6 = inlined_call_operand.vmem [shape: f32[128,128], index: 6, kind: input, shape index: {}]   ;;  %s2013_s7 = inlined_call_operand.vmem [shape: f32[1,128], index: 7, kind: input, shape index: {}]   ;;  %s2014_s8 = inlined_call_operand.vmem [shape: f32[128,128], index: 8, kind: input, shape index: {}]   ;;  %s2015_s9 = inlined_call_operand.vmem [shape: f32[1,128], index: 9, kind: input, shape index: {}]   ;;  %s2016_s10 = inlined_call_operand.vmem [shape: f32[1,128], index: 10, kind: input, shape index: {}]   ;;  %s2017_s11 = inlined_call_operand.vmem [shape: f32[1,128], index: 11, kind: input, shape index: {}]   ;;  %s2018_s12 = inlined_call_operand.vmem [shape: f32[64,128], index: 12, kind: output, shape index: {0}]   ;;  %s2019_s13 = inlined_call_operand.hbm [shape: f32[16,128], index: 13, kind: output, shape index: {1}]  }
   0x1   :  { %2022 = sst [smem:[#allocation13_spill]] %s2019_s13 }
   0x2   :  { %19 = vsyncpa [#allocation7], 0  ;;  %s1641_s25 = smov 0   ;;  %s1643_s26 = smov 0  }
   0x3   :  { %s1645_s27 = smov 0   ;;  %s1647_s28 = smov 0  }
   0x4   :  { %s1649_s29 = smov 0  }
   0x5 LB: > { %2023 = sst [smem:[#allocation9_spill]] %s1551_s27  ;;  %s34_s14 = sadd.s32 1, %s1551_s27  ;;  %s1559_s29 = sphi %s1649_s29, %s25_s29   ;;  %s1555_s28 = sphi %s1647_s28, %s2053_s28   ;;  %s1551_s27 = sphi %s1645_s27, %s2052_s27   ;;  %s1547_s26 = sphi %s1643_s26, %s2051_s26   ;;  %s1543_s25 = sphi %s1641_s25, %s2050_s25  }
   0x6   : > { %2024 = sst [smem:[#allocation10_spill]] %s1555_s28  ;;  %p35_p0 = scmp.ge.s32.totalorder %s34_s14, 2 }
   0x7   : > { %s37_s15 = sadd.s32 1, %s1555_s28  ;;  %p1277_p1 = scmp.ge.s32.totalorder %s1559_s29, 1 }
   0x8   : > { %p421_p2 = scmp.lt.s32.totalorder %s1559_s29, 5  ;;  %s2055_s14 = smov (%p35_p0, %s34_s14), 0 }
   0x9   : > { %2025 = sst [smem:[#allocation11_spill]] %s2055_s14  ;;  %s2057_s15 = smov (!%p35_p0, %s37_s15), %s1555_s28 }
   0xa   : > { %p422_p3 = pnand %p1277_p1, %p421_p2  ;;  %p39_p4 = scmp.ge.s32.totalorder %s2057_s15, 2 }
   0xb   : > { %s1278_s16 = sshll.u32 (!%p422_p3), %s1543_s25, 2  ;;  %p694_p5 = scmp.eq.s32.totalorder (!%p422_p3), %s1547_s26, 0 }
   0xc   : > { %s2059_s15 = smov (%p39_p4, %s2057_s15), 0  ;;  %425 = sbr.rel (%p422_p3) target bundleno = 1414 (0x586), region = 68 }
   0xd   : > { %2026 = sst [smem:[#allocation12_spill]] %s2059_s15  ;;  %p476_p6 = scmp.lt.s32.totalorder (!%p422_p3), %s1278_s16, 7 }
   0xe   : > { %p695_p7 = scmp.eq.s32.totalorder (!%p422_p3), %s1543_s25, 0 }
  0x10   : > { %p1681_p8 = pnand (!%p422_p3), %p695_p7, %p694_p5 }
  0x11   : > { %s2061_s16 = smov (!%p476_p6, %s1278_s16), 7  ;;  %v1426_v0 = vld [vmem:[%s2007_s1] ss:$0 sm:$0xff] }
  0x12   : > { %s1279_s18 = sshll.u32 %s2061_s16, 2  ;;  %s1685_s19 = sshll.u32 %s2061_s16, 3  ;;  %v1427_v13 = vld [vmem:[%s2008_s2] ss:$0 sm:$0xff] }
  0x13   : > { %s479_s22 = scalar_lea.vmem %s2006_s0, %s1279_s18  ;;  %s485_s30 = scalar_lea.vmem %s2009_s3, %s1685_s19 }
  0x14   : > { %s491_s13 = scalar_lea.vmem %s2010_s4, %s1685_s19  ;;  %v1701_v1 = vld [vmem:[%s485_s30] sm:$0xff]  ;;  %v1703_v2 = vld [vmem:[%s485_s30 + $0x8] sm:$0xff]  ;;  %v1705_v3 = vld [vmem:[%s485_s30 + $0x10] sm:$0xff]  ;;  %s497_s14 = scalar_lea.vmem %s2018_s12, %s1685_s19 }
  0x15   : > { %v1707_v4 = vld [vmem:[%s485_s30 + $0x18] sm:$0xff]  ;;  %v1709_v5 = vld [vmem:[%s491_s13] sm:$0xff]  ;;  %v1711_v6 = vld [vmem:[%s491_s13 + $0x8] sm:$0xff] }
  0x16   : > { %v1713_v7 = vld [vmem:[%s491_s13 + $0x10] sm:$0xff]  ;;  %v1715_v8 = vld [vmem:[%s491_s13 + $0x18] sm:$0xff]  ;;  %v1319_v9 = vld [vmem:[%s479_s22] sm:$0xff]  }
  0x17   : > { %v1320_v10 = vunpack.c.l.bf16 %v1319_v9  ;;  %v1321_v11 = vunpack.c.h.bf16 %v1319_v9  ;;  %v1336_v12 = vld [vmem:[%s479_s22 + $0x8] sm:$0xff]  }
  0x18   : > { %v1324_v14 = vunpack.c.l.bf16 %v1336_v12  ;;  %v1325_v15 = vunpack.c.h.bf16 %v1336_v12 }
  0x19   : > { %v520_v16 = vmul.f32 %v1426_v0, %v1320_v10  ;;  %v521_v17 = vmul.f32 %v1426_v0, %v1321_v11 }
  0x1a   : > { %v522_v18 = vmul.f32 %v1426_v0, %v1324_v14  ;;  %v523_v19 = vmul.f32 %v1426_v0, %v1325_v15 }
  0x1b   : > { %v1720_v20 = vadd.f32 %v1427_v13, %v520_v16  ;;  %v1722_v21 = vadd.f32 %v1427_v13, %v521_v17 }
  0x1c   : > { %v1724_v22 = vadd.f32 %v1427_v13, %v522_v18  ;;  %v1726_v23 = vadd.f32 %v1427_v13, %v523_v19 }
  0x1d   : > { %v1286_v24 = vmul.f32 -1.442695, %v1720_v20  ;;  %v1287_v25 = vmul.f32 -1.442695, %v1722_v21 }
  0x1e   : > { %v1288_v26 = vmul.f32 -1.442695, %v1724_v22  ;;  %v1289_v27 = vmul.f32 -1.442695, %v1726_v23 }
  0x1f   : > { %1428 = vpow2.f32 %v1286_v24 }
  0x20   : > { %1430 = vpow2.f32 %v1287_v25 }
  0x21   : > { %1432 = vpow2.f32 %v1288_v26 }
  0x22   : > { %1434 = vpow2.f32 %v1289_v27 }
  0x25   : > { %v1429_v28 = vpop.eup %1428 }
  0x26   : > { %v1431_v29 = vpop.eup %1430  ;;  %v544_v30 = vadd.f32 1.0, %v1429_v28 }
  0x27   : > { %v1433_v31 = vpop.eup %1432  ;;  %v545_v32 = vadd.f32 1.0, %v1431_v29 }
  0x28   : > { %v1435_v33 = vpop.eup %1434  ;;  %1436 = vrcp.f32 %v544_v30  ;;  %v546_v34 = vadd.f32 1.0, %v1433_v31  ;;  %v557_v36 = vand.u32 2147483647, %v544_v30  ;;  %v559_v37 = vand.u32 2147483648, %v544_v30 }
  0x29   : > { %1438 = vrcp.f32 %v545_v32  ;;  %v547_v35 = vadd.f32 1.0, %v1435_v33  ;;  %v572_v39 = vand.u32 2147483647, %v545_v32  ;;  %v574_v40 = vand.u32 2147483648, %v545_v32 }
  0x2a   : > { %1440 = vrcp.f32 %v546_v34  ;;  %vm553_vm0 = vweird.f32 %v544_v30  ;;  %vm568_vm1 = vweird.f32 %v545_v32  ;;  %vm1732_vm3 = vcmp.eq.f32.partialorder %v557_v36, 8.507059e+37 }
  0x2b   : > { %1442 = vrcp.f32 %v547_v35  ;;  %v560_v46 = vor.u32 1.1754944e-38, %v559_v37  ;;  %vm1736_vm5 = vcmp.eq.f32.partialorder %v572_v39, 8.507059e+37  ;;  %v575_v50 = vor.u32 1.1754944e-38, %v574_v40 }
  0x2c   : > { %vm583_vm6 = vweird.f32 %v546_v34  ;;  %v587_v54 = vand.u32 2147483647, %v546_v34  ;;  %v589_v57 = vand.u32 2147483648, %v546_v34  ;;  %vm598_vm8 = vweird.f32 %v547_v35 }
  0x2d   : > { %v604_v62 = vand.u32 2147483648, %v547_v35  ;;  %v602_v9 = vand.u32 2147483647, %v547_v35 }
  0x2e   : > { %v1437_v38 = vpop.eup %1436  ;;  %vm1752_vm12 = vcmp.eq.f32.partialorder %v587_v54, 8.507059e+37  ;;  %v590_v16 = vor.u32 1.1754944e-38, %v589_v57 }
  0x2f   : > { %v1439_v41 = vpop.eup %1438  ;;  %v549_v42 = vmul.f32 %v1437_v38, %v544_v30  ;;  %vm554_vm2 = vweird.f32 %v1437_v38  ;;  %v605_v25 = vor.u32 1.1754944e-38, %v604_v62  ;;  %vm603_vm15 = vcmp.eq.f32.partialorder %v602_v9, 8.507059e+37 }
  0x30   : > { %v564_v43 = vmul.f32 %v1439_v41, %v545_v32  ;;  %v1441_v47 = vpop.eup %1440  ;;  %vm569_vm4 = vweird.f32 %v1439_v41  ;;  %vm1741_vm7 = vmor %vm553_vm0, %vm554_vm2 }
  0x31   : > { %v550_v44 = vsub.f32 1.0, %v549_v42  ;;  %v1443_v51 = vpop.eup %1442  ;;  %v579_v53 = vmul.f32 %v1441_v47, %v546_v34  ;;  %vm1746_vm9 = vmor %vm568_vm1, %vm569_vm4  ;;  %vm584_vm10 = vweird.f32 %v1441_v47 }
  0x32   : > { %v565_v48 = vsub.f32 1.0, %v564_v43  ;;  %v594_v58 = vmul.f32 %v1443_v51, %v547_v35  ;;  %vm599_vm11 = vweird.f32 %v1443_v51  ;;  %vm1765_vm13 = vmor %vm583_vm6, %vm584_vm10 }
  0x33   : > { %v551_v52 = vmul.f32 %v1437_v38, %v550_v44  ;;  %v580_v61 = vsub.f32 1.0, %v579_v53  ;;  %vm600_vm14 = vmor %vm598_vm8, %vm599_vm11 }
  0x34   : > { %v566_v56 = vmul.f32 %v1439_v41, %v565_v48  ;;  %v595_v0 = vsub.f32 1.0, %v594_v58 }
  0x35   : > { %v552_v59 = vadd.f32 %v1437_v38, %v551_v52  ;;  %v581_v11 = vmul.f32 %v1441_v47, %v580_v61 }
  0x36   : > { %v567_v63 = vadd.f32 %v1439_v41, %v566_v56  ;;  %v596_v17 = vmul.f32 %v1443_v51, %v595_v0 }
  0x37   : > { %v556_v10 = vsel %vm1741_vm7, %v1437_v38, %v552_v59  ;;  %v582_v24 = vadd.f32 %v1441_v47, %v581_v11 }
  0x38   : > { %v561_v13 = vsel %vm1732_vm3, %v560_v46, %v556_v10  ;;  %v571_v14 = vsel %vm1746_vm9, %v1439_v41, %v567_v63  ;;  %v597_v27 = vadd.f32 %v1443_v51, %v596_v17 }
  0x39   : > { %v608_v18 = vmul.f32 %v561_v13, %v1720_v20  ;;  %v576_v19 = vsel %vm1736_vm5, %v575_v50, %v571_v14  ;;  %v586_v29 = vsel %vm1765_vm13, %v1441_v47, %v582_v24 }
  0x3a   : > { %v609_v26 = vmul.f32 %v576_v19, %v1722_v21  ;;  %v591_v20 = vsel %vm1752_vm12, %v590_v16, %v586_v29  ;;  %v601_v31 = vsel %vm600_vm14, %v1443_v51, %v597_v27 }
  0x3b   : > { %612 = vst [vmem:[%s497_s14] sm:$0xff] %v608_v18  ;;  %v1290_v28 = vmul.f32 -1.442695, %v608_v18  ;;  %v610_v32 = vmul.f32 %v591_v20, %v1724_v22  ;;  %v606_v33 = vsel %vm603_vm15, %v605_v25, %v601_v31 }
  0x3c   : > { %613 = vst [vmem:[%s497_s14 + $0x8] sm:$0xff] %v609_v26  ;;  %v1291_v30 = vmul.f32 -1.442695, %v609_v26  ;;  %v611_v21 = vmul.f32 %v606_v33, %v1726_v23 }
  0x3d   : > { %1444 = vpow2.f32 %v1290_v28  ;;  %614 = vst [vmem:[%s497_s14 + $0x10] sm:$0xff] %v610_v32  ;;  %v1292_v34 = vmul.f32 -1.442695, %v610_v32 }
  0x3e   : > { %1446 = vpow2.f32 %v1291_v30  ;;  %615 = vst [vmem:[%s497_s14 + $0x18] sm:$0xff] %v611_v21  ;;  %v1293_v35 = vmul.f32 -1.442695, %v611_v21 }
  0x3f   : > { %1448 = vpow2.f32 %v1292_v34 }
  0x40   : > { %1450 = vpow2.f32 %v1293_v35 }
  0x43   : > { %v1445_v36 = vpop.eup %1444 }
  0x44   : > { %v1447_v37 = vpop.eup %1446  ;;  %v628_v38 = vadd.f32 1.0, %v1445_v36 }
  0x45   : > { %v629_v39 = vadd.f32 1.0, %v1447_v37  ;;  %v1449_v40 = vpop.eup %1448 }
  0x46   : > { %1452 = vrcp.f32 %v628_v38  ;;  %v1451_v41 = vpop.eup %1450  ;;  %v630_v42 = vadd.f32 1.0, %v1449_v40  ;;  %v641_v43 = vand.u32 2147483647, %v628_v38  ;;  %v643_v44 = vand.u32 2147483648, %v628_v38 }
  0x47   : > { %1454 = vrcp.f32 %v629_v39  ;;  %v631_v22 = vadd.f32 1.0, %v1451_v41  ;;  %v656_v45 = vand.u32 2147483647, %v629_v39  ;;  %v658_v46 = vand.u32 2147483648, %v629_v39 }
  0x48   : > { %1456 = vrcp.f32 %v630_v42  ;;  %vm637_vm0 = vweird.f32 %v628_v38  ;;  %vm652_vm1 = vweird.f32 %v629_v39  ;;  %vm1780_vm3 = vcmp.eq.f32.partialorder %v641_v43, 8.507059e+37 }
  0x49   : > { %1458 = vrcp.f32 %v631_v22  ;;  %v644_v52 = vor.u32 1.1754944e-38, %v643_v44  ;;  %vm1784_vm5 = vcmp.eq.f32.partialorder %v656_v45, 8.507059e+37  ;;  %v659_v56 = vor.u32 1.1754944e-38, %v658_v46 }
  0x4a   : > { %vm667_vm6 = vweird.f32 %v630_v42  ;;  %v671_v60 = vand.u32 2147483647, %v630_v42  ;;  %v673_v63 = vand.u32 2147483648, %v630_v42  ;;  %vm682_vm8 = vweird.f32 %v631_v22 }
  0x4b   : > { %v688_v12 = vand.u32 2147483648, %v631_v22  ;;  %v686_v15 = vand.u32 2147483647, %v631_v22 }
  0x4c   : > { %v1453_v23 = vpop.eup %1452  ;;  %v674_v24 = vor.u32 1.1754944e-38, %v673_v63  ;;  %vm672_vm13 = vcmp.eq.f32.partialorder %v671_v60, 8.507059e+37 }
  0x4d   : > { %v1455_v47 = vpop.eup %1454  ;;  %v633_v48 = vmul.f32 %v1453_v23, %v628_v38  ;;  %vm638_vm2 = vweird.f32 %v1453_v23  ;;  %v689_v28 = vor.u32 1.1754944e-38, %v688_v12  ;;  %vm687_vm15 = vcmp.eq.f32.partialorder %v686_v15, 8.507059e+37 }
  0x4e   : > { %v648_v49 = vmul.f32 %v1455_v47, %v629_v39  ;;  %v1457_v53 = vpop.eup %1456  ;;  %vm653_vm4 = vweird.f32 %v1455_v47  ;;  %vm1789_vm7 = vmor %vm637_vm0, %vm638_vm2 }
  0x4f   : > { %v634_v50 = vsub.f32 1.0, %v633_v48  ;;  %v1459_v57 = vpop.eup %1458  ;;  %v663_v59 = vmul.f32 %v1457_v53, %v630_v42  ;;  %vm1794_vm9 = vmor %vm652_vm1, %vm653_vm4  ;;  %vm668_vm10 = vweird.f32 %v1457_v53 }
  0x50   : > { %v649_v54 = vsub.f32 1.0, %v648_v49  ;;  %v678_v0 = vmul.f32 %v1459_v57, %v631_v22  ;;  %vm683_vm11 = vweird.f32 %v1459_v57  ;;  %vm669_vm12 = vmor %vm667_vm6, %vm668_vm10 }
  0x51   : > { %v635_v58 = vmul.f32 %v1453_v23, %v634_v50  ;;  %v664_v11 = vsub.f32 1.0, %v663_v59  ;;  %vm684_vm14 = vmor %vm682_vm8, %vm683_vm11 }
  0x52   : > { %v650_v62 = vmul.f32 %v1455_v47, %v649_v54  ;;  %v679_v14 = vsub.f32 1.0, %v678_v0 }
  0x53   : > { %v636_v9 = vadd.f32 %v1453_v23, %v635_v58  ;;  %v665_v17 = vmul.f32 %v1457_v53, %v664_v11 }
  0x54   : > { %v651_v13 = vadd.f32 %v1455_v47, %v650_v62  ;;  %v680_v25 = vmul.f32 %v1459_v57, %v679_v14 }
  0x55   : > { %v640_v16 = vsel %vm1789_vm7, %v1453_v23, %v636_v9  ;;  %v666_v27 = vadd.f32 %v1457_v53, %v665_v17 }
  0x56   : > { %v1802_v18 = vsel %vm1780_vm3, %v644_v52, %v640_v16  ;;  %v655_v19 = vsel %vm1794_vm9, %v1455_v47, %v651_v13  ;;  %v681_v30 = vadd.f32 %v1459_v57, %v680_v25  ;;  %699 = sbr.rel (%p1681_p8) target bundleno = 254 (0xfe), region = 72 }
  0x57   : > { %v1809_v26 = vsel %vm1784_vm5, %v659_v56, %v655_v19  ;;  %v670_v20 = vsel %vm669_vm12, %v1457_v53, %v666_v27 }
  0x58   : > { %v692_v29 = vpack.c.bf16 %v1809_v26, %v1802_v18  ;;  %v1814_v31 = vsel %vm672_vm13, %v674_v24, %v670_v20  ;;  %v685_v32 = vsel %vm684_vm14, %v1459_v57, %v681_v30 }
  0x59   : > { %v1816_v33 = vsel %vm687_vm15, %v689_v28, %v685_v32 }
  0x5a   : > { %v693_v21 = vpack.c.bf16 %v1816_v33, %v1814_v31 }
  0x5b   : > { %v719_v34 = vld [vmem:[%s2014_s8 + $0x78] sm:$0xff]  ;;  %v718_v35 = vld [vmem:[%s2014_s8 + $0x70] sm:$0xff]  ;;  %v1561_v36 = vmov 0.0   ;;  %v717_v37 = vld [vmem:[%s2014_s8 + $0x68] sm:$0xff] }
  0x5c   : > { %700 = vst [vmem:[#allocation2] sm:$0xff] %v1561_v36  ;;  %724 = vmatpush.msra.mxu0 %v719_v34  ;;  %1337 = vmatpush.msra.mxu1 %v719_v34  ;;  %v716_v38 = vld [vmem:[%s2014_s8 + $0x60] sm:$0xff]  ;;  %v715_v39 = vld [vmem:[%s2014_s8 + $0x58] sm:$0xff]  ;;  %v714_v40 = vld [vmem:[%s2014_s8 + $0x50] sm:$0xff] }
  0x5d   : > { %701 = vst [vmem:[#allocation2 + $0x8] sm:$0xff] %v1561_v36  ;;  %v713_v41 = vld [vmem:[%s2014_s8 + $0x48] sm:$0xff]  ;;  %v712_v42 = vld [vmem:[%s2014_s8 + $0x40] sm:$0xff]  ;;  %v711_v22 = vld [vmem:[%s2014_s8 + $0x38] sm:$0xff] }
  0x5e   : > { %725 = vmatpush.msra.mxu0 %v718_v35  ;;  %1338 = vmatpush.msra.mxu1 %v718_v35  ;;  %v710_v43 = vld [vmem:[%s2014_s8 + $0x30] sm:$0xff]  ;;  %v709_v44 = vld [vmem:[%s2014_s8 + $0x28] sm:$0xff]  ;;  %v708_v23 = vld [vmem:[%s2014_s8 + $0x20] sm:$0xff] }
  0x5f   : > { %v707_v45 = vld [vmem:[%s2014_s8 + $0x18] sm:$0xff]  ;;  %v706_v46 = vld [vmem:[%s2014_s8 + $0x10] sm:$0xff]  ;;  %v705_v47 = vld [vmem:[%s2014_s8 + $0x8] sm:$0xff] }
  0x60   : > { %726 = vmatpush.msra.mxu0 %v717_v37  ;;  %1339 = vmatpush.msra.mxu1 %v717_v37  ;;  %v704_v48 = vld [vmem:[%s2014_s8] sm:$0xff]  ;;  %v703_v50 = vld [vmem:[%s2011_s5 + $0x8] sm:$0xff] }
  0x61   : > { %v702_v49 = vld [vmem:[%s2011_s5] sm:$0xff] }
  0x62   : > { %727 = vmatpush.msra.mxu0 %v716_v38  ;;  %1340 = vmatpush.msra.mxu1 %v716_v38  ;;  %v1460_v51 = vld [vmem:[%s2015_s9] ss:$0 sm:$0xff] }
  0x64   : > { %728 = vmatpush.msra.mxu0 %v715_v39  ;;  %1341 = vmatpush.msra.mxu1 %v715_v39 }
  0x66   : > { %729 = vmatpush.msra.mxu0 %v714_v40  ;;  %1342 = vmatpush.msra.mxu1 %v714_v40 }
  0x68   : > { %730 = vmatpush.msra.mxu0 %v713_v41  ;;  %1343 = vmatpush.msra.mxu1 %v713_v41 }
  0x6a   : > { %731 = vmatpush.msra.mxu0 %v712_v42  ;;  %1344 = vmatpush.msra.mxu1 %v712_v42 }
  0x6c   : > { %732 = vmatpush.msra.mxu0 %v711_v22  ;;  %1345 = vmatpush.msra.mxu1 %v711_v22 }
  0x6e   : > { %733 = vmatpush.msra.mxu0 %v710_v43  ;;  %1346 = vmatpush.msra.mxu1 %v710_v43 }
  0x70   : > { %734 = vmatpush.msra.mxu0 %v709_v44  ;;  %1347 = vmatpush.msra.mxu1 %v709_v44 }
  0x72   : > { %735 = vmatpush.msra.mxu0 %v708_v23  ;;  %1348 = vmatpush.msra.mxu1 %v708_v23 }
  0x74   : > { %736 = vmatpush.msra.mxu0 %v707_v45  ;;  %1349 = vmatpush.msra.mxu1 %v707_v45 }
  0x76   : > { %737 = vmatpush.msra.mxu0 %v706_v46  ;;  %1350 = vmatpush.msra.mxu1 %v706_v46 }
  0x78   : > { %738 = vmatpush.msra.mxu0 %v705_v47  ;;  %1351 = vmatpush.msra.mxu1 %v705_v47 }
  0x7a   : > { %739 = vmatpush.msra.mxu0 %v704_v48  ;;  %1352 = vmatpush.msra.mxu1 %v704_v48 }
  0x7b   : > { %740 = vmatmul.f32.vlgmr.msra.gmra.mxu0 %v702_v49  ;;  %743 = vmatmul.f32.vlgmr.msra.gmra.mxu1 %v703_v50 }
  0xf8   : > { %v741_v52 = vpop.f32.mrf.mxu0  ;;  %v744_v53 = vpop.f32.mrf.mxu1 }
  0xf9   : > { %v742_v54 = vadd.f32 %v1460_v51, %v741_v52  ;;  %v745_v55 = vadd.f32 %v1460_v51, %v744_v53 }
  0xfb   : > { %v1329_v56 = vpack.c.bf16 %v745_v55, %v742_v54 }
  0xfd   : > { %1330 = vst [vmem:[#allocation4] sm:$0xff] %v1329_v56  }
  0xfe PF: > { %p1294_p9 = scmp.ne.s32.totalorder %s1547_s26, 0 }
 0x100   : > { %753 = sbr.rel (%p1294_p9) target bundleno = 689 (0x2b1), region = 76 }
 0x105   : > { %806 = vmatpush.bf16.msra.mxu0 %v693_v21  ;;  %v1562_v57 = vmov 0   ;;  %v754_v58 = vlaneseq  ;;  %v1563_v63 = vmov 0.0   ;;  %vm796_vm4 = vcmask 261120   ;;  %v778_v16 = vld [vmem:[#allocation2] sm:$0xff]  ;;  %v779_v24 = vld [vmem:[#allocation2 + $0x8] sm:$0xff] }
 0x106   : > { %1461 = vset.pattern.permute.xlu0 %v1562_v57  ;;  %1462 = vset.pattern.permute.xlu1 %v1562_v57 }
 0x107   : > { %757 = vperm.xlu0 %1461, %v1701_v1   ;;  %763 = vperm.xlu1 %1462, %v1705_v3   ;;  %v755_v60 = vand.u32 127, %v754_v58 }
 0x109   : > { %807 = vmatpush.bf16.msra.mxu0 %v692_v29 }
 0x10f   : > { %760 = vperm.xlu0 %1461, %v1703_v2   ;;  %766 = vperm.xlu1 %1462, %v1707_v4  }
 0x179   : > { %v758_v59 = vpop.permute.xlu0 %757  ;;  %v764_v61 = vpop.permute.xlu1 %763 }
 0x17a   : > { %vm768_vm0 = vcmp.eq.s32.totalorder %v758_v59, %v755_v60  ;;  %vm770_vm2 = vcmp.eq.s32.totalorder %v764_v61, %v755_v60 }
 0x17b   : > { %v772_v0 = vsel %vm768_vm0, 1.0, %v1563_v63  ;;  %v774_v12 = vsel %vm770_vm2, 1.0, %v1563_v63 }
 0x181   : > { %v761_v62 = vpop.permute.xlu0 %760  ;;  %v767_v11 = vpop.permute.xlu1 %766 }
 0x182   : > { %vm769_vm1 = vcmp.eq.s32.totalorder %v761_v62, %v755_v60  ;;  %vm771_vm3 = vcmp.eq.s32.totalorder %v767_v11, %v755_v60 }
 0x183   : > { %v773_v9 = vsel %vm769_vm1, 1.0, %v1563_v63  ;;  %v775_v13 = vsel %vm771_vm3, 1.0, %v1563_v63 }
 0x184   : > { %v776_v10 = vpack.c.bf16 %v773_v9, %v772_v0  ;;  %v777_v14 = vpack.c.bf16 %v775_v13, %v774_v12 }
 0x186   : > { %780 = vxpose.xlu2.c.b16.start [1/2] (short) (narrow) %v776_v10, 16 }
 0x196   : > { %781 = vxpose.xlu2.c.b16.end [2/2] (short) (narrow) %v777_v14, 16 }
 0x227   : > { %v788_v15 = vpop.trf.xlu2 }
 0x228   : > { %1295 = vmatmul.msk.bf16.vlgmr.msra.gmra.mxu0 %vm796_vm4, %v788_v15 }
 0x2a5   : > { %v809_v17 = vpop.f32.mrf.mxu0 }
 0x2a6   : > { %v814_v19 = vadd.f32 %v809_v17, %v778_v16 }
 0x2a8   : > { %816 = vst [vmem:[#allocation2] sm:$0xff] %v814_v19 }
 0x2ad   : > { %v811_v25 = vpop.f32.mrf.mxu0 }
 0x2ae   : > { %v815_v27 = vadd.f32 %v811_v25, %v779_v24 }
 0x2b0   : > { %817 = vst [vmem:[#allocation2 + $0x8] sm:$0xff] %v815_v27 }
 0x2b1 PF: > { %p818_p10 = scmp.eq.s32.totalorder %s1547_s26, 1 }
 0x2b3   : > { %p819_p11 = pnand %p818_p10, %p695_p7 }
 0x2b5   : > { %822 = sbr.rel (%p819_p11) target bundleno = 702 (0x2be), region = 80 }
 0x2ba   : > { %v823_v28 = vld [vmem:[#allocation2] sm:$0xff]  ;;  %v824_v29 = vld [vmem:[#allocation2 + $0x8] sm:$0xff]  ;;  %v1564_v20 = vmov 0.0  }
 0x2bb   : > { %v1334_v30 = vpack.c.bf16 %v824_v29, %v823_v28  ;;  %829 = vst [vmem:[#allocation5 + $0x8] sm:$0xff] %v1564_v20 }
 0x2bc   : > { %830 = vst [vmem:[#allocation5] sm:$0xff] %v1564_v20 }
 0x2bd   : > { %1335 = vst [vmem:[#allocation3] sm:$0xff] %v1334_v30  }
 0x2be PF: > { %p1296_p12 = scmp.ne.s32.totalorder %s1547_s26, 1 }
 0x2c0   : > { %833 = sbr.rel (%p1296_p12) target bundleno = 1153 (0x481), region = 84 }
 0x2c5   : > { %v1565_v32 = vmov 0   ;;  %v1316_v21 = vld [vmem:[#allocation3] sm:$0xff]  ;;  %v834_v34 = vlaneseq  ;;  %v1317_v36 = vld [vmem:[#allocation4] sm:$0xff]  ;;  %vm890_vm7 = vcmask 130048   ;;  %vm979_vm14 = vcmask 261120  }
 0x2c6   : > { %1464 = vset.pattern.permute.xlu1 %v1565_v32  ;;  %1463 = vset.pattern.permute.xlu0 %v1565_v32 }
 0x2c7   : > { %843 = vperm.xlu1 %1464, %v1705_v3   ;;  %837 = vperm.xlu0 %1463, %v1701_v1   ;;  %v835_v3 = vand.u32 127, %v834_v34  ;;  %v1566_v1 = vmov 0.0  }
 0x2c8   : > { %1465 = vset.pattern.permute.xlu2 %v1565_v32  ;;  %935 = vmatpush.bf16.msra.mxu1 %v1316_v21 }
 0x2c9   : > { %865 = vperm.xlu2 %1465, %v1713_v7   ;;  %1353 = vmatpush.bf16.msra.mxu3 %v1317_v36 }
 0x2ca   : > { %904 = vmatpush.bf16.msra.mxu0 %v1317_v36 }
 0x2cf   : > { %846 = vperm.xlu1 %1464, %v1707_v4   ;;  %840 = vperm.xlu0 %1463, %v1703_v2  }
 0x2d1   : > { %868 = vperm.xlu2 %1465, %v1715_v8  }
 0x2d7   : > { %862 = vperm.xlu1 %1464, %v1711_v6   ;;  %859 = vperm.xlu0 %1463, %v1709_v5  }
 0x323   : > { %v866_v35 = vpop.permute.xlu2 %865 }
 0x324   : > { %vm872_vm5 = vcmp.eq.s32.totalorder %v866_v35, %v835_v3 }
 0x325   : > { %v876_v7 = vsel %vm872_vm5, 1.0, %v1566_v1 }
 0x32b   : > { %v869_v4 = vpop.permute.xlu2 %868 }
 0x32c   : > { %vm873_vm6 = vcmp.eq.s32.totalorder %v869_v4, %v835_v3 }
 0x32d   : > { %v877_v2 = vsel %vm873_vm6, 1.0, %v1566_v1 }
 0x32e   : > { %v879_v37 = vpack.c.bf16 %v877_v2, %v876_v7 }
 0x330   : > { %1302 = vmatmul.msk.bf16.vlgmr.msra.gmra.mxu3 %vm890_vm7, %v879_v37 }
 0x339   : > { %v844_v6 = vpop.permute.xlu1 %843  ;;  %v838_v5 = vpop.permute.xlu0 %837 }
 0x33a   : > { %vm848_vm8 = vcmp.eq.s32.totalorder %v838_v5, %v835_v3  ;;  %vm850_vm12 = vcmp.eq.s32.totalorder %v844_v6, %v835_v3 }
 0x33b   : > { %v852_v39 = vsel %vm848_vm8, 1.0, %v1566_v1  ;;  %v854_v45 = vsel %vm850_vm12, 1.0, %v1566_v1 }
 0x341   : > { %v847_v8 = vpop.permute.xlu1 %846  ;;  %v841_v38 = vpop.permute.xlu0 %840 }
 0x342   : > { %vm849_vm9 = vcmp.eq.s32.totalorder %v841_v38, %v835_v3  ;;  %vm851_vm13 = vcmp.eq.s32.totalorder %v847_v8, %v835_v3 }
 0x343   : > { %v853_v40 = vsel %vm849_vm9, 1.0, %v1566_v1  ;;  %v855_v46 = vsel %vm851_vm13, 1.0, %v1566_v1 }
 0x344   : > { %v856_v41 = vpack.c.bf16 %v853_v40, %v852_v39  ;;  %v857_v47 = vpack.c.bf16 %v855_v46, %v854_v45 }
 0x346   : > { %963 = vxpose.xlu2.c.b16.start [1/2] (short) (narrow) %v856_v41, 16  ;;  %1307 = vmatmul.msk.bf16.vlgmr.msra.gmra.mxu1 %vm890_vm7, %v856_v41 }
 0x349   : > { %v863_v42 = vpop.permute.xlu1 %862  ;;  %v860_v22 = vpop.permute.xlu0 %859 }
 0x34a   : > { %vm871_vm10 = vcmp.eq.s32.totalorder %v863_v42, %v835_v3  ;;  %vm870_vm11 = vcmp.eq.s32.totalorder %v860_v22, %v835_v3 }
 0x34b   : > { %v875_v43 = vsel %vm871_vm10, 1.0, %v1566_v1  ;;  %v874_v44 = vsel %vm870_vm11, 1.0, %v1566_v1 }
 0x34c   : > { %v878_v23 = vpack.c.bf16 %v875_v43, %v874_v44 }
 0x34e   : > { %1301 = vmatmul.msk.bf16.vlgmr.msra.gmra.mxu0 %vm890_vm7, %v878_v23 }
 0x356   : > { %964 = vxpose.xlu2.c.b16.end [2/2] (short) (narrow) %v857_v47, 16  ;;  %1308 = vmatmul.msk.bf16.gmra.mxu1 %vm890_vm7, %v857_v47 }
 0x3b3   : > { %v911_v55 = vpop.f32.mrf.mxu3 }
 0x3bb   : > { %v913_v9 = vpop.f32.mrf.mxu3 }
 0x3c3   : > { %v937_v48 = vpop.f32.mrf.mxu1 }
 0x3c4   : > { %v938_v53 = vadd.f32 1e-06, %v937_v48 }
 0x3cb   : > { %v939_v49 = vpop.f32.mrf.mxu1  ;;  %v906_v57 = vpop.f32.mrf.mxu0 }
 0x3cc   : > { %v940_v52 = vadd.f32 1e-06, %v939_v49 }
 0x3d3   : > { %v942_v50 = vpop.f32.mrf.mxu1  ;;  %v908_v13 = vpop.f32.mrf.mxu0 }
 0x3d4   : > { %v943_v51 = vadd.f32 1e-06, %v942_v50 }
 0x3d6   : > { %1466 = vrcp.f32 %v943_v51 }
 0x3d7   : > { %1468 = vrcp.f32 %v940_v52 }
 0x3d8   : > { %1470 = vrcp.f32 %v938_v53 }
 0x3db   : > { %v944_v54 = vpop.f32.mrf.mxu1 }
 0x3dc   : > { %v945_v56 = vadd.f32 1e-06, %v944_v54  ;;  %v1467_v58 = vpop.eup %1466 }
 0x3dd   : > { %v1469_v59 = vpop.eup %1468  ;;  %v953_v61 = vmul.f32 %v1467_v58, %v1814_v31  ;;  %v961_v31 = vld [vmem:[#allocation5 + $0x8] sm:$0xff] }
 0x3de   : > { %1472 = vrcp.f32 %v945_v56  ;;  %v1471_v60 = vpop.eup %1470  ;;  %v952_v63 = vmul.f32 %v1469_v59, %v1809_v26 }
 0x3df   : > { %v951_v10 = vmul.f32 %v1471_v60, %v1802_v18  ;;  %v957_v11 = vmul.f32 %v953_v61, %v911_v55 }
 0x3e0   : > { %v956_v14 = vmul.f32 %v952_v63, %v908_v13 }
 0x3e1   : > { %v955_v16 = vmul.f32 %v951_v10, %v906_v57 }
 0x3e3   : > { %v959_v17 = vpack.c.bf16 %v956_v14, %v955_v16 }
 0x3e4   : > { %v1473_v62 = vpop.eup %1472 }
 0x3e5   : > { %v954_v0 = vmul.f32 %v1473_v62, %v1816_v33  ;;  %v962_v33 = vld [vmem:[#allocation5] sm:$0xff] }
 0x3e7   : > { %v958_v12 = vmul.f32 %v954_v0, %v913_v9  ;;  %v971_v19 = vpop.trf.xlu2 }
 0x3e9   : > { %v960_v15 = vpack.c.bf16 %v958_v12, %v957_v11 }
 0x3eb   : > { %989 = vmatpush.bf16.msra.mxu2 %v960_v15 }
 0x3ef   : > { %990 = vmatpush.bf16.msra.mxu2 %v959_v17 }
 0x3f2   : > { %1309 = vmatmul.msk.bf16.vlgmr.msra.gmra.mxu2 %vm979_vm14, %v971_v19 }
 0x475   : > { %v992_v24 = vpop.f32.mrf.mxu2 }
 0x476   : > { %v997_v26 = vadd.f32 %v992_v24, %v961_v31 }
 0x478   : > { %999 = vst [vmem:[#allocation5 + $0x8] sm:$0xff] %v997_v26 }
 0x47d   : > { %v994_v25 = vpop.f32.mrf.mxu2 }
 0x47e   : > { %v998_v27 = vadd.f32 %v994_v25, %v962_v33 }
 0x480   : > { %1000 = vst [vmem:[#allocation5] sm:$0xff] %v998_v27 }
 0x481 PF: > { %p1001_p13 = scmp.eq.s32.totalorder %s1543_s25, 1 }
 0x483   : > { %p1002_p0 = pnand %p1001_p13, %p818_p10 }
 0x485   : > { %1005 = sbr.rel (%p1002_p0) target bundleno = 1404 (0x57c), region = 88 }
 0x48a   : > { %v1023_v18 = vld [vmem:[%s2012_s6 + $0x78] sm:$0xff]  ;;  %v1022_v28 = vld [vmem:[%s2012_s6 + $0x70] sm:$0xff]  ;;  %v1021_v29 = vld [vmem:[%s2012_s6 + $0x68] sm:$0xff]  ;;  %v1567_v8 = vmov 16.0  }
 0x48b   : > { %1028 = vmatpush.msra.mxu0 %v1023_v18  ;;  %1354 = vmatpush.msra.mxu1 %v1023_v18  ;;  %v1020_v30 = vld [vmem:[%s2012_s6 + $0x60] sm:$0xff]  ;;  %v1019_v20 = vld [vmem:[%s2012_s6 + $0x58] sm:$0xff]  ;;  %v1018_v32 = vld [vmem:[%s2012_s6 + $0x50] sm:$0xff]  ;;  %1477 = vrcp.f32 %v1567_v8 }
 0x48c   : > { %v1017_v21 = vld [vmem:[%s2012_s6 + $0x48] sm:$0xff]  ;;  %v1016_v34 = vld [vmem:[%s2012_s6 + $0x40] sm:$0xff]  ;;  %v1015_v35 = vld [vmem:[%s2012_s6 + $0x38] sm:$0xff] }
 0x48d   : > { %1029 = vmatpush.msra.mxu0 %v1022_v28  ;;  %1355 = vmatpush.msra.mxu1 %v1022_v28  ;;  %v1014_v3 = vld [vmem:[%s2012_s6 + $0x30] sm:$0xff]  ;;  %v1013_v36 = vld [vmem:[%s2012_s6 + $0x28] sm:$0xff]  ;;  %v1012_v1 = vld [vmem:[%s2012_s6 + $0x20] sm:$0xff] }
 0x48e   : > { %v1011_v7 = vld [vmem:[%s2012_s6 + $0x18] sm:$0xff]  ;;  %v1010_v4 = vld [vmem:[%s2012_s6 + $0x10] sm:$0xff]  ;;  %v1009_v2 = vld [vmem:[%s2012_s6 + $0x8] sm:$0xff] }
 0x48f   : > { %1030 = vmatpush.msra.mxu0 %v1021_v29  ;;  %1356 = vmatpush.msra.mxu1 %v1021_v29  ;;  %v1008_v37 = vld [vmem:[%s2012_s6] sm:$0xff]  ;;  %v1971_v5 = vld [vmem:[%s2011_s5 + $0x8] sm:$0xff] }
 0x490   : > { %v1966_v6 = vld [vmem:[%s2011_s5] sm:$0xff]  ;;  %v1051_v41 = vld [vmem:[#allocation5 + $0x8] sm:$0xff] }
 0x491   : > { %1031 = vmatpush.msra.mxu0 %v1020_v30  ;;  %1357 = vmatpush.msra.mxu1 %v1020_v30  ;;  %v1478_v38 = vpop.eup %1477  ;;  %v1474_v39 = vld [vmem:[%s2013_s7] ss:$0 sm:$0xff] }
 0x492   : > { %v1052_v22 = vld [vmem:[#allocation5] sm:$0xff]  ;;  %v1063_v43 = vmul.f32 16.0, %v1478_v38  ;;  %vm1067_vm15 = vweird.f32 %v1478_v38 }
 0x493   : > { %1032 = vmatpush.msra.mxu0 %v1019_v20  ;;  %1358 = vmatpush.msra.mxu1 %v1019_v20  ;;  %v1475_v27 = vld [vmem:[%s2016_s10] ss:$0 sm:$0xff] }
 0x494   : > { %v1064_v47 = vsub.f32 1.0, %v1063_v43  ;;  %v1476_v30 = vld [vmem:[%s2017_s11] ss:$0 sm:$0xff] }
 0x495   : > { %1033 = vmatpush.msra.mxu0 %v1018_v32  ;;  %1359 = vmatpush.msra.mxu1 %v1018_v32 }
 0x496   : > { %v1065_v53 = vmul.f32 %v1478_v38, %v1064_v47 }
 0x497   : > { %1034 = vmatpush.msra.mxu0 %v1017_v21  ;;  %1360 = vmatpush.msra.mxu1 %v1017_v21 }
 0x498   : > { %v1066_v58 = vadd.f32 %v1478_v38, %v1065_v53 }
 0x499   : > { %1035 = vmatpush.msra.mxu0 %v1016_v34  ;;  %1361 = vmatpush.msra.mxu1 %v1016_v34 }
 0x49a   : > { %v1068_v63 = vsel %vm1067_vm15, %v1478_v38, %v1066_v58 }
 0x49b   : > { %1036 = vmatpush.msra.mxu0 %v1015_v35  ;;  %1362 = vmatpush.msra.mxu1 %v1015_v35 }
 0x49d   : > { %1037 = vmatpush.msra.mxu0 %v1014_v3  ;;  %1363 = vmatpush.msra.mxu1 %v1014_v3 }
 0x49f   : > { %1038 = vmatpush.msra.mxu0 %v1013_v36  ;;  %1364 = vmatpush.msra.mxu1 %v1013_v36 }
 0x4a1   : > { %1039 = vmatpush.msra.mxu0 %v1012_v1  ;;  %1365 = vmatpush.msra.mxu1 %v1012_v1 }
 0x4a3   : > { %1040 = vmatpush.msra.mxu0 %v1011_v7  ;;  %1366 = vmatpush.msra.mxu1 %v1011_v7 }
 0x4a5   : > { %1041 = vmatpush.msra.mxu0 %v1010_v4  ;;  %1367 = vmatpush.msra.mxu1 %v1010_v4 }
 0x4a7   : > { %1042 = vmatpush.msra.mxu0 %v1009_v2  ;;  %1368 = vmatpush.msra.mxu1 %v1009_v2 }
 0x4a9   : > { %1043 = vmatpush.msra.mxu0 %v1008_v37  ;;  %1369 = vmatpush.msra.mxu1 %v1008_v37 }
 0x4aa   : > { %1044 = vmatmul.f32.vlgmr.msra.gmra.mxu0 %v1966_v6  ;;  %1047 = vmatmul.f32.vlgmr.msra.gmra.mxu1 %v1971_v5 }
 0x527   : > { %v1045_v40 = vpop.f32.mrf.mxu0  ;;  %v1048_v42 = vpop.f32.mrf.mxu1 }
 0x528   : > { %v1046_v44 = vadd.f32 %v1474_v39, %v1045_v40  ;;  %v1049_v23 = vadd.f32 %v1474_v39, %v1048_v42 }
 0x52a   : > { %v1053_v45 = vadd.f32 %v1051_v41, %v1046_v44  ;;  %v1054_v46 = vadd.f32 %v1052_v22, %v1049_v23 }
 0x52c   : > { %v1070_v48 = vmul.f32 %v1053_v45, %v1053_v45  ;;  %v1055_v49 = vadd.f32 %v1054_v46, %v1053_v45  ;;  %v1071_v50 = vmul.f32 %v1054_v46, %v1054_v46 }
 0x52e   : > { %v1056_v51 = vrot.slane %v1055_v49, 4  ;;  %v1072_v52 = vadd.f32 %v1071_v50, %v1070_v48 }
 0x530   : > { %v1057_v54 = vadd.f32 %v1056_v51, %v1055_v49  ;;  %v1073_v55 = vrot.slane %v1072_v52, 4 }
 0x532   : > { %v1058_v56 = vrot.slane %v1057_v54, 2  ;;  %v1074_v57 = vadd.f32 %v1073_v55, %v1072_v52 }
 0x534   : > { %v1059_v59 = vadd.f32 %v1058_v56, %v1057_v54  ;;  %v1075_v60 = vrot.slane %v1074_v57, 2 }
 0x536   : > { %v1060_v61 = vrot.slane %v1059_v59, 1  ;;  %v1076_v62 = vadd.f32 %v1075_v60, %v1074_v57 }
 0x538   : > { %v1061_v0 = vadd.f32 %v1060_v61, %v1059_v59  ;;  %v1077_v9 = vrot.slane %v1076_v62, 1 }
 0x53a   : > { %v1069_v10 = vmul.f32 %v1068_v63, %v1061_v0  ;;  %v1078_v11 = vadd.f32 %v1077_v9, %v1076_v62 }
 0x53c   : > { %v1079_v12 = vmul.f32 %v1078_v11, %v1068_v63  ;;  %v1080_v13 = vmul.f32 %v1069_v10, %v1069_v10  ;;  %v1082_v33 = vsub.f32 %v1053_v45, %v1069_v10  ;;  %v1083_v25 = vsub.f32 %v1054_v46, %v1069_v10 }
 0x53e   : > { %v1081_v14 = vsub.f32 %v1079_v12, %v1080_v13 }
 0x540   : > { %v1084_v15 = vadd.f32 1e-05, %v1081_v14 }
 0x542   : > { %1479 = vrsqrt.f32 %v1084_v15  ;;  %vm1091_vm1 = vweird.f32 %v1084_v15 }
 0x548   : > { %v1480_v16 = vpop.eup %1479 }
 0x549   : > { %v1086_v17 = vmul.f32 %v1480_v16, %v1084_v15  ;;  %vm1092_vm0 = vweird.f32 %v1480_v16 }
 0x54a   : > { %vm1093_vm2 = vmor %vm1091_vm1, %vm1092_vm0 }
 0x54b   : > { %v1087_v19 = vmul.f32 %v1480_v16, %v1086_v17 }
 0x54d   : > { %v1088_v31 = vmul.f32 0.5, %v1087_v19 }
 0x54f   : > { %v1089_v24 = vsub.f32 1.5, %v1088_v31 }
 0x551   : > { %v1090_v26 = vmul.f32 %v1480_v16, %v1089_v24 }
 0x553   : > { %v1094_v18 = vsel %vm1093_vm2, %v1480_v16, %v1090_v26 }
 0x554   : > { %v1095_v28 = vmul.f32 %v1094_v18, %v1082_v33  ;;  %v1096_v29 = vmul.f32 %v1094_v18, %v1083_v25 }
 0x556   : > { %v1101_v20 = vmul.f32 %v1475_v27, %v1095_v28  ;;  %v1102_v32 = vmul.f32 %v1475_v27, %v1096_v29 }
 0x558   : > { %v1107_v21 = vadd.f32 %v1476_v30, %v1101_v20  ;;  %v1108_v34 = vadd.f32 %v1476_v30, %v1102_v32 }
 0x55a   : > { %v1310_v35 = vmul.f32 -1.442695, %v1107_v21  ;;  %v1311_v3 = vmul.f32 -1.442695, %v1108_v34 }
 0x55c   : > { %1481 = vpow2.f32 %v1310_v35 }
 0x55d   : > { %1483 = vpow2.f32 %v1311_v3 }
 0x562   : > { %v1482_v36 = vpop.eup %1481 }
 0x563   : > { %v1484_v1 = vpop.eup %1483  ;;  %v1115_v7 = vadd.f32 1.0, %v1482_v36 }
 0x564   : > { %v1116_v4 = vadd.f32 1.0, %v1484_v1 }
 0x565   : > { %1485 = vrcp.f32 %v1115_v7  ;;  %v1128_v40 = vand.u32 2147483648, %v1115_v7  ;;  %v1126_v22 = vand.u32 2147483647, %v1115_v7  ;;  %vm1122_vm5 = vweird.f32 %v1115_v7 }
 0x566   : > { %1487 = vrcp.f32 %v1116_v4  ;;  %v1143_v43 = vand.u32 2147483648, %v1116_v4  ;;  %v1141_v23 = vand.u32 2147483647, %v1116_v4  ;;  %vm1137_vm7 = vweird.f32 %v1116_v4 }
 0x567   : > { %v1129_v46 = vor.u32 1.1754944e-38, %v1128_v40  ;;  %vm1127_vm8 = vcmp.eq.f32.partialorder %v1126_v22, 8.507059e+37 }
 0x568   : > { %v1144_v49 = vor.u32 1.1754944e-38, %v1143_v43  ;;  %vm1142_vm10 = vcmp.eq.f32.partialorder %v1141_v23, 8.507059e+37 }
 0x56b   : > { %v1486_v2 = vpop.eup %1485 }
 0x56c   : > { %v1488_v37 = vpop.eup %1487  ;;  %v1118_v8 = vmul.f32 %v1486_v2, %v1115_v7  ;;  %vm1123_vm3 = vweird.f32 %v1486_v2 }
 0x56d   : > { %v1133_v38 = vmul.f32 %v1488_v37, %v1116_v4  ;;  %vm1138_vm4 = vweird.f32 %v1488_v37  ;;  %vm1124_vm6 = vmor %vm1122_vm5, %vm1123_vm3 }
 0x56e   : > { %v1119_v39 = vsub.f32 1.0, %v1118_v8  ;;  %vm1139_vm9 = vmor %vm1137_vm7, %vm1138_vm4 }
 0x56f   : > { %v1134_v41 = vsub.f32 1.0, %v1133_v38 }
 0x570   : > { %v1120_v42 = vmul.f32 %v1486_v2, %v1119_v39 }
 0x571   : > { %v1135_v44 = vmul.f32 %v1488_v37, %v1134_v41 }
 0x572   : > { %v1121_v45 = vadd.f32 %v1486_v2, %v1120_v42 }
 0x573   : > { %v1136_v47 = vadd.f32 %v1488_v37, %v1135_v44 }
 0x574   : > { %v1125_v48 = vsel %vm1124_vm6, %v1486_v2, %v1121_v45 }
 0x575   : > { %v1130_v50 = vsel %vm1127_vm8, %v1129_v46, %v1125_v48  ;;  %v1140_v51 = vsel %vm1139_vm9, %v1488_v37, %v1136_v47 }
 0x576   : > { %v1145_v52 = vsel %vm1142_vm10, %v1144_v49, %v1140_v51  ;;  %v1147_v53 = vmul.f32 %v1130_v50, %v1107_v21 }
 0x577   : > { %v1148_v54 = vmul.f32 %v1145_v52, %v1108_v34 }
 0x578   : > { %v1149_v55 = vadd.f32 %v1147_v53, %v1966_v6 }
 0x579   : > { %v1150_v56 = vadd.f32 %v1148_v54, %v1971_v5 }
 0x57a   : > { %1151 = vst [vmem:[#allocation6] sm:$0xff] %v1149_v55 }
 0x57b   : > { %1152 = vst [vmem:[#allocation6 + $0x8] sm:$0xff] %v1150_v56 }
 0x57c PF: > { %s2048_s14 = sadd.s32 4294967295, %s1559_s29   ;;  %s2049_s18 = sld [smem:[#allocation13_spill]] }
 0x57d   : > { %p1374_p1 = scmp.eq.s32.totalorder %s2048_s14, 3  ;;  %s1568_s20 = smov [#allocation6]  }
 0x57e   : > { %s1167_s21 = sshll.u32 %s1568_s20, 4  ;;  %s1569_s17 = smov 128   ;;  %s1168_s21 = int_to_ptr.vmem [resolvable:$true] %s1167_s21 }
 0x57f   : > { %s1570_s22 = smov 8  }
 0x582   : > { %s1169_s19 = sshll.u32 %s2049_s18, 4  ;;  %s1170_s19 = int_to_ptr.hbm [resolvable:$true] %s1169_s19 }
 0x583   : > { %1371 = dma.vmem_to_hbm [thread:$0]  (%p1374_p1), %s1168_s21, 256, %s1170_s19, [#allocation7], %s1569_s17, %s1569_s17, %s1570_s22  }
 0x584   : > { %1538 = dma.done.wait (%p1374_p1), [#allocation7], 256  }
 0x585   : > { %1540 = vsyncadd (%p1374_p1), [#allocation7], 4294967040 }
 0x586 PF: > { %s25_s29 = sadd.s32 1, %s1559_s29   ;;  %s2050_s25 = sld [smem:[#allocation9_spill]] }
 0x587   : > { %p22_p2 = scmp.ge.s32.totalorder %s25_s29, 6   ;;  %s2051_s26 = sld [smem:[#allocation10_spill]] }
 0x588   : > { %s2052_s27 = sld [smem:[#allocation11_spill]] }
 0x589   : > { %s2053_s28 = sld [smem:[#allocation12_spill]]  ;;  %24 = sbr.rel (!%p22_p2) target bundleno = 5 (0x5), region = 133 }
 0x58e   :  { %1194 = vsyncpa [#allocation7], 1 }
 0x58f   :  { %1196 = vsyncpa [#allocation7 + $0x1], 1 }

</bundles_post_ra>
